<compile_context>
chip_gen: v7x
topology: tpu7x:2x2x1
jax: 0.10.0
libtpu: 0.0.40
codegen_flags: <defaults>
</compile_context>

<pallas_src>
import functools

import jax
import jax.numpy as jnp
from jax.experimental import pallas as pl
from jax.experimental.pallas import tpu as pltpu

# Layer sizes of the torch.nn.Sequential MLP.
LAYER_SIZES = [8, 100, 85, 70, 55, 40, 25, 10, 1]
NUM_LAYERS = len(LAYER_SIZES) - 1  # 8 Linear layers
PAD = 128                          # every feature dim is zero-padded to 128


def mlp_kernel(x_ref, w_ref, b_ref, out_ref):
    """Fused MLP forward on one batch tile.

    x_ref:   (TB, 128)       zero-padded activations (features on lanes)
    w_ref:   (8, 128, 128)   zero-padded weights, (in, out) layout per layer
    b_ref:   (8, 1, 128)     zero-padded biases
    out_ref: (TB, 128)       lane-dense output tile (only column 0 is real)
    """
    h = x_ref[...]  # (TB, 128) f32
    for layer in range(NUM_LAYERS):
        w = w_ref[layer]          # (128, 128)
        b = b_ref[layer]          # (1, 128)
        h = jnp.dot(h, w, preferred_element_type=jnp.float32) + b
        if layer < NUM_LAYERS - 1:
            h = jnp.maximum(h, 0.0)  # ReLU on all but the last layer
    out_ref[...] = h.astype(out_ref.dtype)


def pack_params(params):
    """Zero-pad and stack (W, b) pairs into (8,128,128) and (8,1,128)."""
    w_stack = jnp.zeros((NUM_LAYERS, PAD, PAD), jnp.float32)
    b_stack = jnp.zeros((NUM_LAYERS, 1, PAD), jnp.float32)
    for layer, (w, b) in enumerate(params):
        fan_in, fan_out = w.shape
        w_stack = w_stack.at[layer, :fan_in, :fan_out].set(w)
        b_stack = b_stack.at[layer, 0, :fan_out].set(jnp.reshape(b, (-1,)))
    return w_stack, b_stack


@functools.partial(jax.jit, static_argnames=("batch_tile",))
def mlp_forward(x, w_stack, b_stack, *, batch_tile=256):
    """Run the fused MLP kernel.

    x:        (B, 8) float32 (B may be ragged; padded internally)
    w_stack:  (8, 128, 128)  zero-padded weights in (in, out) layout
    b_stack:  (8, 1, 128)    zero-padded biases
    returns:  (B, 1) float32
    """
    B, in_dim = x.shape
    assert in_dim == LAYER_SIZES[0]
    assert batch_tile % 8 == 0

    # Pad batch to a multiple of the tile and features to 128 lanes.
    b_pad = ((B + batch_tile - 1) // batch_tile) * batch_tile
    x_pad = jnp.zeros((b_pad, PAD), jnp.float32)
    x_pad = x_pad.at[:B, :in_dim].set(x.astype(jnp.float32))

    grid = (b_pad // batch_tile,)

    # Advisory cost hint for XLA scheduling around the custom call.
    cost = pl.CostEstimate(
        flops=2 * b_pad * NUM_LAYERS * PAD * PAD,
        transcendentals=0,
        bytes_accessed=4 * (x_pad.size + b_pad * PAD
                            + w_stack.size + b_stack.size),
    )

    out_pad = pl.pallas_call(
        mlp_kernel,
        out_shape=jax.ShapeDtypeStruct((b_pad, PAD), jnp.float32),
        grid_spec=pltpu.PrefetchScalarGridSpec(
            num_scalar_prefetch=0,
            grid=grid,
            in_specs=[
                pl.BlockSpec((batch_tile, PAD), lambda i: (i, 0)),
                # Weights / biases are small (~520 KB total): fully resident.
                pl.BlockSpec((NUM_LAYERS, PAD, PAD), lambda i: (0, 0, 0)),
                pl.BlockSpec((NUM_LAYERS, 1, PAD), lambda i: (0, 0, 0)),
            ],
            out_specs=pl.BlockSpec((batch_tile, PAD), lambda i: (i, 0)),
        ),
        compiler_params=pltpu.CompilerParams(
            dimension_semantics=("parallel",)),
        cost_estimate=cost,
    )(x_pad, w_stack, b_stack)

    # Only column 0 and the first B rows are real.
    return out_pad[:B, :LAYER_SIZES[-1]]


def init_params(key):
    """Deterministic init mirroring PyTorch nn.Linear default:
    U(-1/sqrt(fan_in), 1/sqrt(fan_in)) for both weight and bias."""
    params = []
    for layer in range(NUM_LAYERS):
        fan_in = LAYER_SIZES[layer]
        fan_out = LAYER_SIZES[layer + 1]
        key, wk, bk = jax.random.split(key, 3)
        bound = 1.0 / jnp.sqrt(jnp.float32(fan_in))
        # Stored directly in (in, out) layout used by the kernel
        # (PyTorch stores (out, in) and computes x @ W.T + b; equivalent).
        w = jax.random.uniform(wk, (fan_in, fan_out), jnp.float32,
                               minval=-bound, maxval=bound)
        b = jax.random.uniform(bk, (fan_out,), jnp.float32,
                               minval=-bound, maxval=bound)
        params.append((w, b))
    return params


def reference_forward(x, params):
    h = x
    for layer, (w, b) in enumerate(params):
        h = h @ w + b[None, :]
        if layer < NUM_LAYERS - 1:
            h = jnp.maximum(h, 0.0)
    return h


if __name__ == "__main__":
    key = jax.random.PRNGKey(0)
    pkey, xkey = jax.random.split(key)

    params = init_params(pkey)
    w_stack, b_stack = pack_params(params)

    # Small, ragged batch: exercises batch padding and a multi-step grid.
    B = 200
    x = jax.random.normal(xkey, (B, LAYER_SIZES[0]), jnp.float32)

    out = mlp_forward(x, w_stack, b_stack, batch_tile=128)
    out = jax.block_until_ready(out)

    ref = reference_forward(x, params)
    assert out.shape == (B, 1)
    assert jnp.allclose(out, ref, atol=1e-4, rtol=1e-4), "mismatch vs JAX reference"

    print("KERNEL_OK")
</pallas_src>

<mosaic_0001>
module attributes {stable_mosaic.version = 11 : i64} {
  func.func @mlp_kernel(%arg0: i32, %arg1: memref<128x128xf32, #tpu.memory_space<vmem>>, %arg2: memref<8x128x128xf32, #tpu.memory_space<vmem>>, %arg3: memref<8x1x128xf32, #tpu.memory_space<vmem>>, %arg4: memref<128x128xf32, #tpu.memory_space<vmem>>) attributes {dimension_semantics = [#tpu.dimension_semantics<parallel>], iteration_bounds = array<i64: 2>, scalar_prefetch = 0 : i64, scratch_operands = 0 : i64, tpu.core_type = #tpu.core_type<tc>, window_params = [{transform_indices = @transform_0, window_bounds = array<i64: 128, 128>}, {pipeline_mode = #tpu.pipeline_mode<synchronous>, transform_indices = @transform_1, window_bounds = array<i64: 8, 128, 128>}, {pipeline_mode = #tpu.pipeline_mode<synchronous>, transform_indices = @transform_2, window_bounds = array<i64: 8, 1, 128>}, {transform_indices = @transform_3, window_bounds = array<i64: 128, 128>}]} {
    %c0 = arith.constant 0 : index
    %c0_0 = arith.constant 0 : index
    %0 = vector.load %arg1[%c0, %c0_0] : memref<128x128xf32, #tpu.memory_space<vmem>>, vector<128x128xf32>
    %c0_1 = arith.constant 0 : index
    %c0_2 = arith.constant 0 : index
    %c0_3 = arith.constant 0 : index
    %1 = vector.load %arg2[%c0_1, %c0_2, %c0_3] : memref<8x128x128xf32, #tpu.memory_space<vmem>>, vector<1x128x128xf32>
    %2 = vector.shape_cast %1 : vector<1x128x128xf32> to vector<128x128xf32>
    %c0_4 = arith.constant 0 : index
    %c0_5 = arith.constant 0 : index
    %c0_6 = arith.constant 0 : index
    %3 = vector.load %arg3[%c0_4, %c0_5, %c0_6] : memref<8x1x128xf32, #tpu.memory_space<vmem>>, vector<1x1x128xf32>
    %4 = vector.shape_cast %3 : vector<1x1x128xf32> to vector<1x128xf32>
    %cst = arith.constant dense<0.000000e+00> : vector<128x128xf32>
    %5 = tpu.matmul %0, %2, %cst {dimension_numbers = #tpu.dot_dimension_numbers<[1], [0], [0], [1], [0, 0, 1, 1], [], []>} : vector<128x128xf32>, vector<128x128xf32>, vector<128x128xf32> -> vector<128x128xf32>
    %6 = vector.broadcast %4 : vector<1x128xf32> to vector<128x128xf32>
    %7 = arith.addf %5, %6 : vector<128x128xf32>
    %cst_7 = arith.constant 0.000000e+00 : f32
    %8 = vector.broadcast %cst_7 : f32 to vector<128x128xf32>
    %9 = arith.maximumf %7, %8 : vector<128x128xf32>
    %c1 = arith.constant 1 : index
    %c0_8 = arith.constant 0 : index
    %c0_9 = arith.constant 0 : index
    %10 = vector.load %arg2[%c1, %c0_8, %c0_9] : memref<8x128x128xf32, #tpu.memory_space<vmem>>, vector<1x128x128xf32>
    %11 = vector.shape_cast %10 : vector<1x128x128xf32> to vector<128x128xf32>
    %c1_10 = arith.constant 1 : index
    %c0_11 = arith.constant 0 : index
    %c0_12 = arith.constant 0 : index
    %12 = vector.load %arg3[%c1_10, %c0_11, %c0_12] : memref<8x1x128xf32, #tpu.memory_space<vmem>>, vector<1x1x128xf32>
    %13 = vector.shape_cast %12 : vector<1x1x128xf32> to vector<1x128xf32>
    %cst_13 = arith.constant dense<0.000000e+00> : vector<128x128xf32>
    %14 = tpu.matmul %9, %11, %cst_13 {dimension_numbers = #tpu.dot_dimension_numbers<[1], [0], [0], [1], [0, 0, 1, 1], [], []>} : vector<128x128xf32>, vector<128x128xf32>, vector<128x128xf32> -> vector<128x128xf32>
    %15 = vector.broadcast %13 : vector<1x128xf32> to vector<128x128xf32>
    %16 = arith.addf %14, %15 : vector<128x128xf32>
    %cst_14 = arith.constant 0.000000e+00 : f32
    %17 = vector.broadcast %cst_14 : f32 to vector<128x128xf32>
    %18 = arith.maximumf %16, %17 : vector<128x128xf32>
    %c2 = arith.constant 2 : index
    %c0_15 = arith.constant 0 : index
    %c0_16 = arith.constant 0 : index
    %19 = vector.load %arg2[%c2, %c0_15, %c0_16] : memref<8x128x128xf32, #tpu.memory_space<vmem>>, vector<1x128x128xf32>
    %20 = vector.shape_cast %19 : vector<1x128x128xf32> to vector<128x128xf32>
    %c2_17 = arith.constant 2 : index
    %c0_18 = arith.constant 0 : index
    %c0_19 = arith.constant 0 : index
    %21 = vector.load %arg3[%c2_17, %c0_18, %c0_19] : memref<8x1x128xf32, #tpu.memory_space<vmem>>, vector<1x1x128xf32>
    %22 = vector.shape_cast %21 : vector<1x1x128xf32> to vector<1x128xf32>
    %cst_20 = arith.constant dense<0.000000e+00> : vector<128x128xf32>
    %23 = tpu.matmul %18, %20, %cst_20 {dimension_numbers = #tpu.dot_dimension_numbers<[1], [0], [0], [1], [0, 0, 1, 1], [], []>} : vector<128x128xf32>, vector<128x128xf32>, vector<128x128xf32> -> vector<128x128xf32>
    %24 = vector.broadcast %22 : vector<1x128xf32> to vector<128x128xf32>
    %25 = arith.addf %23, %24 : vector<128x128xf32>
    %cst_21 = arith.constant 0.000000e+00 : f32
    %26 = vector.broadcast %cst_21 : f32 to vector<128x128xf32>
    %27 = arith.maximumf %25, %26 : vector<128x128xf32>
    %c3 = arith.constant 3 : index
    %c0_22 = arith.constant 0 : index
    %c0_23 = arith.constant 0 : index
    %28 = vector.load %arg2[%c3, %c0_22, %c0_23] : memref<8x128x128xf32, #tpu.memory_space<vmem>>, vector<1x128x128xf32>
    %29 = vector.shape_cast %28 : vector<1x128x128xf32> to vector<128x128xf32>
    %c3_24 = arith.constant 3 : index
    %c0_25 = arith.constant 0 : index
    %c0_26 = arith.constant 0 : index
    %30 = vector.load %arg3[%c3_24, %c0_25, %c0_26] : memref<8x1x128xf32, #tpu.memory_space<vmem>>, vector<1x1x128xf32>
    %31 = vector.shape_cast %30 : vector<1x1x128xf32> to vector<1x128xf32>
    %cst_27 = arith.constant dense<0.000000e+00> : vector<128x128xf32>
    %32 = tpu.matmul %27, %29, %cst_27 {dimension_numbers = #tpu.dot_dimension_numbers<[1], [0], [0], [1], [0, 0, 1, 1], [], []>} : vector<128x128xf32>, vector<128x128xf32>, vector<128x128xf32> -> vector<128x128xf32>
    %33 = vector.broadcast %31 : vector<1x128xf32> to vector<128x128xf32>
    %34 = arith.addf %32, %33 : vector<128x128xf32>
    %cst_28 = arith.constant 0.000000e+00 : f32
    %35 = vector.broadcast %cst_28 : f32 to vector<128x128xf32>
    %36 = arith.maximumf %34, %35 : vector<128x128xf32>
    %c4 = arith.constant 4 : index
    %c0_29 = arith.constant 0 : index
    %c0_30 = arith.constant 0 : index
    %37 = vector.load %arg2[%c4, %c0_29, %c0_30] : memref<8x128x128xf32, #tpu.memory_space<vmem>>, vector<1x128x128xf32>
    %38 = vector.shape_cast %37 : vector<1x128x128xf32> to vector<128x128xf32>
    %c4_31 = arith.constant 4 : index
    %c0_32 = arith.constant 0 : index
    %c0_33 = arith.constant 0 : index
    %39 = vector.load %arg3[%c4_31, %c0_32, %c0_33] : memref<8x1x128xf32, #tpu.memory_space<vmem>>, vector<1x1x128xf32>
    %40 = vector.shape_cast %39 : vector<1x1x128xf32> to vector<1x128xf32>
    %cst_34 = arith.constant dense<0.000000e+00> : vector<128x128xf32>
    %41 = tpu.matmul %36, %38, %cst_34 {dimension_numbers = #tpu.dot_dimension_numbers<[1], [0], [0], [1], [0, 0, 1, 1], [], []>} : vector<128x128xf32>, vector<128x128xf32>, vector<128x128xf32> -> vector<128x128xf32>
    %42 = vector.broadcast %40 : vector<1x128xf32> to vector<128x128xf32>
    %43 = arith.addf %41, %42 : vector<128x128xf32>
    %cst_35 = arith.constant 0.000000e+00 : f32
    %44 = vector.broadcast %cst_35 : f32 to vector<128x128xf32>
    %45 = arith.maximumf %43, %44 : vector<128x128xf32>
    %c5 = arith.constant 5 : index
    %c0_36 = arith.constant 0 : index
    %c0_37 = arith.constant 0 : index
    %46 = vector.load %arg2[%c5, %c0_36, %c0_37] : memref<8x128x128xf32, #tpu.memory_space<vmem>>, vector<1x128x128xf32>
    %47 = vector.shape_cast %46 : vector<1x128x128xf32> to vector<128x128xf32>
    %c5_38 = arith.constant 5 : index
    %c0_39 = arith.constant 0 : index
    %c0_40 = arith.constant 0 : index
    %48 = vector.load %arg3[%c5_38, %c0_39, %c0_40] : memref<8x1x128xf32, #tpu.memory_space<vmem>>, vector<1x1x128xf32>
    %49 = vector.shape_cast %48 : vector<1x1x128xf32> to vector<1x128xf32>
    %cst_41 = arith.constant dense<0.000000e+00> : vector<128x128xf32>
    %50 = tpu.matmul %45, %47, %cst_41 {dimension_numbers = #tpu.dot_dimension_numbers<[1], [0], [0], [1], [0, 0, 1, 1], [], []>} : vector<128x128xf32>, vector<128x128xf32>, vector<128x128xf32> -> vector<128x128xf32>
    %51 = vector.broadcast %49 : vector<1x128xf32> to vector<128x128xf32>
    %52 = arith.addf %50, %51 : vector<128x128xf32>
    %cst_42 = arith.constant 0.000000e+00 : f32
    %53 = vector.broadcast %cst_42 : f32 to vector<128x128xf32>
    %54 = arith.maximumf %52, %53 : vector<128x128xf32>
    %c6 = arith.constant 6 : index
    %c0_43 = arith.constant 0 : index
    %c0_44 = arith.constant 0 : index
    %55 = vector.load %arg2[%c6, %c0_43, %c0_44] : memref<8x128x128xf32, #tpu.memory_space<vmem>>, vector<1x128x128xf32>
    %56 = vector.shape_cast %55 : vector<1x128x128xf32> to vector<128x128xf32>
    %c6_45 = arith.constant 6 : index
    %c0_46 = arith.constant 0 : index
    %c0_47 = arith.constant 0 : index
    %57 = vector.load %arg3[%c6_45, %c0_46, %c0_47] : memref<8x1x128xf32, #tpu.memory_space<vmem>>, vector<1x1x128xf32>
    %58 = vector.shape_cast %57 : vector<1x1x128xf32> to vector<1x128xf32>
    %cst_48 = arith.constant dense<0.000000e+00> : vector<128x128xf32>
    %59 = tpu.matmul %54, %56, %cst_48 {dimension_numbers = #tpu.dot_dimension_numbers<[1], [0], [0], [1], [0, 0, 1, 1], [], []>} : vector<128x128xf32>, vector<128x128xf32>, vector<128x128xf32> -> vector<128x128xf32>
    %60 = vector.broadcast %58 : vector<1x128xf32> to vector<128x128xf32>
    %61 = arith.addf %59, %60 : vector<128x128xf32>
    %cst_49 = arith.constant 0.000000e+00 : f32
    %62 = vector.broadcast %cst_49 : f32 to vector<128x128xf32>
    %63 = arith.maximumf %61, %62 : vector<128x128xf32>
    %c7 = arith.constant 7 : index
    %c0_50 = arith.constant 0 : index
    %c0_51 = arith.constant 0 : index
    %64 = vector.load %arg2[%c7, %c0_50, %c0_51] : memref<8x128x128xf32, #tpu.memory_space<vmem>>, vector<1x128x128xf32>
    %65 = vector.shape_cast %64 : vector<1x128x128xf32> to vector<128x128xf32>
    %c7_52 = arith.constant 7 : index
    %c0_53 = arith.constant 0 : index
    %c0_54 = arith.constant 0 : index
    %66 = vector.load %arg3[%c7_52, %c0_53, %c0_54] : memref<8x1x128xf32, #tpu.memory_space<vmem>>, vector<1x1x128xf32>
    %67 = vector.shape_cast %66 : vector<1x1x128xf32> to vector<1x128xf32>
    %cst_55 = arith.constant dense<0.000000e+00> : vector<128x128xf32>
    %68 = tpu.matmul %63, %65, %cst_55 {dimension_numbers = #tpu.dot_dimension_numbers<[1], [0], [0], [1], [0, 0, 1, 1], [], []>} : vector<128x128xf32>, vector<128x128xf32>, vector<128x128xf32> -> vector<128x128xf32>
    %69 = vector.broadcast %67 : vector<1x128xf32> to vector<128x128xf32>
    %70 = arith.addf %68, %69 : vector<128x128xf32>
    %c0_56 = arith.constant 0 : index
    %c0_57 = arith.constant 0 : index
    %71 = vector.load %arg4[%c0_56, %c0_57] : memref<128x128xf32, #tpu.memory_space<vmem>>, vector<128x128xf32>
    tpu.vector_store %arg4[%c0_56, %c0_57], %70 {strides = array<i32>} : memref<128x128xf32, #tpu.memory_space<vmem>>, vector<128x128xf32>,
    return
  }
  func.func @transform_0(%arg0: i32) -> (i32, i32) {
    %c0_i32 = arith.constant 0 : i32
    %c0_i32_0 = arith.constant 0 : i32
    return %arg0, %c0_i32 : i32, i32
  }
  func.func @transform_1(%arg0: i32) -> (i32, i32, i32) {
    %c0_i32 = arith.constant 0 : i32
    %c0_i32_0 = arith.constant 0 : i32
    %c0_i32_1 = arith.constant 0 : i32
    %c0_i32_2 = arith.constant 0 : i32
    return %c0_i32, %c0_i32_0, %c0_i32_1 : i32, i32, i32
  }
  func.func @transform_2(%arg0: i32) -> (i32, i32, i32) {
    %c0_i32 = arith.constant 0 : i32
    %c0_i32_0 = arith.constant 0 : i32
    %c0_i32_1 = arith.constant 0 : i32
    %c0_i32_2 = arith.constant 0 : i32
    return %c0_i32, %c0_i32_0, %c0_i32_1 : i32, i32, i32
  }
  func.func @transform_3(%arg0: i32) -> (i32, i32) {
    %c0_i32 = arith.constant 0 : i32
    %c0_i32_0 = arith.constant 0 : i32
    return %arg0, %c0_i32 : i32, i32
  }
}

</mosaic_0001>

<bundles_post_ra>
// kernel: mlp_forward.1
= control target key start
LH: loop header
LB: loop body
LE: loop exit
PB: predicated region body
PF: predicated region fallthrough
CT: control target
= control target key end

     0   :  { %8 = vsyncpa [#allocation3], 0  ;;  %s2831_s12 = smov 0   ;;  %s2957_s0 = inlined_call_operand.vmem [shape: f32[256,128], index: 0, kind: input, shape index: {}]   ;;  %s2958_s1 = inlined_call_operand.hbm [shape: f32[8,128,128], index: 1, kind: input, shape index: {}]   ;;  %s2959_s2 = inlined_call_operand.vmem [shape: f32[8,1,128], index: 2, kind: input, shape index: {}]   ;;  %s2960_s3 = inlined_call_operand.vmem [shape: f32[256,128], index: 3, kind: output, shape index: {}]  }
   0x1 LB: > { %s1759_s13 = sadd.s32 4294967295, %s2806_s12   ;;  %p1761_p0 = scmp.ge.s32.totalorder %s2806_s12, 1  ;;  %s2806_s12 = sphi %s2831_s12, %s14_s12  }
   0x2   : > { %p113_p1 = scmp.lt.s32.totalorder %s2806_s12, 3  ;;  %s2808_s14 = smov [#allocation2]  }
   0x3   : > { %s125_s15 = sshll.u32 %s2808_s14, 4  ;;  %p2845_p3 = scmp.eq.s32.totalorder %s1759_s13, 0  ;;  %s126_s15 = int_to_ptr.vmem [resolvable:$true] %s125_s15 }
   0x4   : > { %p2839_p2 = pnand %p1761_p0, %p113_p1  ;;  %s2768_s21 = scalar_lea.hbm %s2958_s1, 16384 }
   0x5   : > { %s2965_s17 = scalar_select %p2845_p3, 1, 0 }
   0x6   : > { %s2964_s16 = scalar_select %p2839_p2, 1, 0 }
   0x7   : > { %p2751_p4 = pneg %p2839_p2  ;;  %p2769_p6 = scmp.ne.s32.totalorder %s2958_s1, %s2768_s21 }
   0x8   : > { %p2775_p10 = scmp.lt.u32.totalorder %s2768_s21, %s2958_s1 }
   0x9   : > { %p2853_p5 = pnand %p2845_p3, %p2751_p4 }
   0xb   : > { %p2770_p7 = pneg %p2853_p5 }
   0xd   : > { %p2771_p8 = pnand %p2770_p7, %p2769_p6 }
   0xf   : > { %p2772_p9 = pneg %p2771_p8 }
  0x11   : > { %p2777_p11 = pnand %p2775_p10, %p2772_p9 }
  0x13   : > { %2780 = shalt.err (!%p2777_p11)
}
  0x14   : > { %s2781_s26 = scalar_lea.vmem %s126_s15, 16384  ;;  %p2789_p1 = scmp.lt.s32.totalorder %s126_s15, %s126_s15 }
  0x15   : > { %p2782_p12 = scmp.ne.s32.totalorder %s126_s15, %s2781_s26  ;;  %p2790_p4 = scmp.lt.s32.totalorder %s2781_s26, %s2781_s26 }
  0x17   : > { %p2784_p13 = pnand %p2782_p12, %p2770_p7  ;;  %p2791_p3 = por %p2790_p4, %p2789_p1 }
  0x19   : > { %p2785_p0 = pneg %p2784_p13 }
  0x1b   : > { %p2792_p2 = pnand %p2791_p3, %p2785_p0 }
  0x1d   : > { %2795 = shalt.err (!%p2792_p2)
}
  0x1e   : > { %s2809_s27 = smov 128   ;;  %s2810_s28 = smov 8  }
  0x1f   : > { %2754 = dma.hbm_to_vmem [thread:$0]  (!%p2853_p5), %s2958_s1, 16384, %s126_s15, [#allocation3], %s2809_s27, %s2809_s27, %s2810_s28  }
  0x20   : > { %p2967_p6 = scmp.ne.s32.totalorder %s2964_s16, 0 }
  0x21   : > { %p2968_p8 = scmp.ne.s32.totalorder (!%p2967_p6), %s2965_s17, 0 }
  0x22   : > { %153 = sbr.rel (%p2967_p6) target bundleno = 1847 (0x737), region = 32 }
  0x29   : > { %2801 = dma.done.wait (%p2968_p8), [#allocation3], 16384  }
  0x2a   : > { %2803 = vsyncadd (%p2968_p8), [#allocation3], 4294950912  ;;  %s1766_s4 = sshll.u32 %s1759_s13, 4  ;;  %v205_v0 = vld [vmem:[#allocation2] sm:$0xff]  ;;  %v206_v1 = vld [vmem:[#allocation2 + $0x8] sm:$0xff] }
  0x2b   : > { %p178_p2 = scmp.lt.s32.totalorder %s1766_s4, 31  ;;  %v207_v2 = vld [vmem:[#allocation2 + $0x10] sm:$0xff]  ;;  %v2491_v3 = vpack.c.bf16 %v206_v1, %v205_v0  ;;  %v208_v4 = vld [vmem:[#allocation2 + $0x18] sm:$0xff]  ;;  %v209_v6 = vld [vmem:[#allocation2 + $0x20] sm:$0xff] }
  0x2c   : > { %v2495_v5 = vpack.c.bf16 %v208_v4, %v207_v2  ;;  %v210_v7 = vld [vmem:[#allocation2 + $0x28] sm:$0xff]  ;;  %v211_v10 = vld [vmem:[#allocation2 + $0x30] sm:$0xff]  ;;  %v212_v11 = vld [vmem:[#allocation2 + $0x38] sm:$0xff] }
  0x2d   : > { %s2970_s4 = smov (!%p178_p2, %s1766_s4), 31  ;;  %2492 = vmatprep.subr.bf16.mxu0 %v2491_v3  ;;  %v2499_v8 = vpack.c.bf16 %v210_v7, %v209_v6  ;;  %v2503_v12 = vpack.c.bf16 %v212_v11, %v211_v10  ;;  %v213_v13 = vld [vmem:[#allocation2 + $0x40] sm:$0xff]  ;;  %v214_v14 = vld [vmem:[#allocation2 + $0x48] sm:$0xff]  ;;  %v392_v17 = vld [vmem:[#allocation2 + $0x90] sm:$0xff] }
  0x2e   : > { %s1767_s5 = sshll.u32 %s2970_s4, 3  ;;  %2494 = vmatpush3.bf16.msra.mxu0 %v2491_v3  ;;  %v390_v15 = vld [vmem:[#allocation2 + $0x80] sm:$0xff]  ;;  %v391_v16 = vld [vmem:[#allocation2 + $0x88] sm:$0xff]  ;;  %v393_v18 = vld [vmem:[#allocation2 + $0x98] sm:$0xff]  ;;  %v2507_v21 = vpack.c.bf16 %v214_v14, %v213_v13 }
  0x2f   : > { %s2889_s8 = scalar_lea.vmem %s2957_s0, %s1767_s5  ;;  %2496 = vmatprep.subr.bf16.mxu0 %v2495_v5  ;;  %v2523_v19 = vpack.c.bf16 %v391_v16, %v390_v15  ;;  %v2527_v20 = vpack.c.bf16 %v393_v18, %v392_v17  ;;  %v394_v22 = vld [vmem:[#allocation2 + $0xa0] sm:$0xff]  ;;  %v395_v23 = vld [vmem:[#allocation2 + $0xa8] sm:$0xff]  ;;  %v215_v24 = vld [vmem:[#allocation2 + $0x50] sm:$0xff]  ;;  %s2936_s28 = scalar_lea.vmem %s2960_s3, %s1767_s5 }
  0x30   : > { %v189_v9 = vld [vmem:[%s2889_s8] sm:$0xff]  ;;  %v216_v25 = vld [vmem:[#allocation2 + $0x58] sm:$0xff]  ;;  %v2531_v26 = vpack.c.bf16 %v395_v23, %v394_v22  ;;  %v396_v28 = vld [vmem:[#allocation2 + $0xb0] sm:$0xff] }
  0x31   : > { %2075 = vmatprep.mubr.f32.mxu0 %v189_v9  ;;  %2524 = vmatprep.subr.bf16.mxu1 %v2523_v19  ;;  %v2511_v27 = vpack.c.bf16 %v216_v25, %v215_v24  ;;  %v397_v29 = vld [vmem:[#allocation2 + $0xb8] sm:$0xff]  ;;  %v217_v30 = vld [vmem:[#allocation2 + $0x60] sm:$0xff]  ;;  %v218_v31 = vld [vmem:[#allocation2 + $0x68] sm:$0xff] }
  0x32   : > { %2498 = vmatpush3.bf16.msra.mxu0 %v2495_v5  ;;  %2526 = vmatpush3.bf16.msra.mxu1 %v2523_v19  ;;  %v2535_v32 = vpack.c.bf16 %v397_v29, %v396_v28  ;;  %v2515_v33 = vpack.c.bf16 %v218_v31, %v217_v30  ;;  %v398_v34 = vld [vmem:[#allocation2 + $0xc0] sm:$0xff]  ;;  %v399_v35 = vld [vmem:[#allocation2 + $0xc8] sm:$0xff]  ;;  %v219_v36 = vld [vmem:[#allocation2 + $0x70] sm:$0xff] }
  0x33   : > { %2500 = vmatprep.subr.bf16.mxu0 %v2499_v8  ;;  %2528 = vmatprep.subr.bf16.mxu1 %v2527_v20  ;;  %v220_v37 = vld [vmem:[#allocation2 + $0x78] sm:$0xff]  ;;  %v2539_v38 = vpack.c.bf16 %v399_v35, %v398_v34  ;;  %v400_v40 = vld [vmem:[#allocation2 + $0xd0] sm:$0xff]  ;;  %v402_v43 = vld [vmem:[#allocation2 + $0xe0] sm:$0xff] }
  0x34   : > { %v2519_v39 = vpack.c.bf16 %v220_v37, %v219_v36  ;;  %v401_v41 = vld [vmem:[#allocation2 + $0xd8] sm:$0xff]  ;;  %v403_v44 = vld [vmem:[#allocation2 + $0xe8] sm:$0xff]  ;;  %v191_v47 = vld [vmem:[%s2889_s8 + $0x10] sm:$0xff] }
  0x35   : > { %v2543_v42 = vpack.c.bf16 %v401_v41, %v400_v40  ;;  %v190_v45 = vld [vmem:[%s2889_s8 + $0x8] sm:$0xff]  ;;  %v2547_v46 = vpack.c.bf16 %v403_v44, %v402_v43  ;;  %v192_v48 = vld [vmem:[%s2889_s8 + $0x18] sm:$0xff]  ;;  %v193_v49 = vld [vmem:[%s2889_s8 + $0x20] sm:$0xff] }
  0x36   : > { %2502 = vmatpush3.bf16.msra.mxu0 %v2499_v8  ;;  %2530 = vmatpush3.bf16.msra.mxu1 %v2527_v20  ;;  %v194_v50 = vld [vmem:[%s2889_s8 + $0x28] sm:$0xff]  ;;  %v195_v51 = vld [vmem:[%s2889_s8 + $0x30] sm:$0xff]  ;;  %v196_v52 = vld [vmem:[%s2889_s8 + $0x38] sm:$0xff] }
  0x37   : > { %2504 = vmatprep.subr.bf16.mxu0 %v2503_v12  ;;  %2532 = vmatprep.subr.bf16.mxu1 %v2531_v26  ;;  %v197_v53 = vld [vmem:[%s2889_s8 + $0x40] sm:$0xff]  ;;  %v198_v54 = vld [vmem:[%s2889_s8 + $0x48] sm:$0xff]  ;;  %v199_v55 = vld [vmem:[%s2889_s8 + $0x50] sm:$0xff] }
  0x38   : > { %v200_v56 = vld [vmem:[%s2889_s8 + $0x58] sm:$0xff]  ;;  %v201_v57 = vld [vmem:[%s2889_s8 + $0x60] sm:$0xff]  ;;  %v202_v58 = vld [vmem:[%s2889_s8 + $0x68] sm:$0xff] }
  0x39   : > { %v203_v59 = vld [vmem:[%s2889_s8 + $0x70] sm:$0xff]  ;;  %v204_v60 = vld [vmem:[%s2889_s8 + $0x78] sm:$0xff]  ;;  %v576_v0 = vld [vmem:[#allocation2 + $0x100] sm:$0xff] }
  0x3a   : > { %2506 = vmatpush3.bf16.msra.mxu0 %v2503_v12  ;;  %2534 = vmatpush3.bf16.msra.mxu1 %v2531_v26  ;;  %v404_v61 = vld [vmem:[#allocation2 + $0xf0] sm:$0xff]  ;;  %v405_v62 = vld [vmem:[#allocation2 + $0xf8] sm:$0xff]  ;;  %v577_v1 = vld [vmem:[#allocation2 + $0x108] sm:$0xff] }
  0x3b   : > { %2508 = vmatprep.subr.bf16.mxu0 %v2507_v21  ;;  %2536 = vmatprep.subr.bf16.mxu1 %v2535_v32  ;;  %v2551_v63 = vpack.c.bf16 %v405_v62, %v404_v61  ;;  %v578_v2 = vld [vmem:[#allocation2 + $0x110] sm:$0xff]  ;;  %v2555_v3 = vpack.c.bf16 %v577_v1, %v576_v0  ;;  %v579_v4 = vld [vmem:[#allocation2 + $0x118] sm:$0xff]  ;;  %v580_v6 = vld [vmem:[#allocation2 + $0x120] sm:$0xff] }
  0x3c   : > { %v2559_v5 = vpack.c.bf16 %v579_v4, %v578_v2  ;;  %v581_v7 = vld [vmem:[#allocation2 + $0x128] sm:$0xff]  ;;  %v582_v9 = vld [vmem:[#allocation2 + $0x130] sm:$0xff]  ;;  %v583_v10 = vld [vmem:[#allocation2 + $0x138] sm:$0xff] }
  0x3d   : > { %v2563_v8 = vpack.c.bf16 %v581_v7, %v580_v6  ;;  %v2567_v11 = vpack.c.bf16 %v583_v10, %v582_v9  ;;  %v584_v12 = vld [vmem:[#allocation2 + $0x140] sm:$0xff]  ;;  %v585_v13 = vld [vmem:[#allocation2 + $0x148] sm:$0xff]  ;;  %v586_v15 = vld [vmem:[#allocation2 + $0x150] sm:$0xff] }
  0x3e   : > { %2510 = vmatpush3.bf16.msra.mxu0 %v2507_v21  ;;  %2538 = vmatpush3.bf16.msra.mxu1 %v2535_v32  ;;  %v2571_v14 = vpack.c.bf16 %v585_v13, %v584_v12  ;;  %v587_v16 = vld [vmem:[#allocation2 + $0x158] sm:$0xff]  ;;  %v588_v18 = vld [vmem:[#allocation2 + $0x160] sm:$0xff]  ;;  %v589_v19 = vld [vmem:[#allocation2 + $0x168] sm:$0xff] }
  0x3f   : > { %2512 = vmatprep.subr.bf16.mxu0 %v2511_v27  ;;  %2540 = vmatprep.subr.bf16.mxu1 %v2539_v38  ;;  %v2575_v17 = vpack.c.bf16 %v587_v16, %v586_v15  ;;  %v2579_v20 = vpack.c.bf16 %v589_v19, %v588_v18  ;;  %v1770_v21 = vld [vmem:[%s2959_s2] ss:$0 sm:$0xff]  ;;  %v590_v6 = vld [vmem:[#allocation2 + $0x170] sm:$0xff]  ;;  %v591_v7 = vld [vmem:[#allocation2 + $0x178] sm:$0xff] }
  0x40   : > { %v762_v9 = vld [vmem:[#allocation2 + $0x180] sm:$0xff]  ;;  %v763_v10 = vld [vmem:[#allocation2 + $0x188] sm:$0xff]  ;;  %v765_v13 = vld [vmem:[#allocation2 + $0x198] sm:$0xff] }
  0x41   : > { %v2587_v12 = vpack.c.bf16 %v763_v10, %v762_v9  ;;  %v766_v15 = vld [vmem:[#allocation2 + $0x1a0] sm:$0xff]  ;;  %v767_v16 = vld [vmem:[#allocation2 + $0x1a8] sm:$0xff]  ;;  %v768_v18 = vld [vmem:[#allocation2 + $0x1b0] sm:$0xff] }
  0x42   : > { %2514 = vmatpush3.bf16.msra.mxu0 %v2511_v27  ;;  %2542 = vmatpush3.bf16.msra.mxu1 %v2539_v38  ;;  %v769_v19 = vld [vmem:[#allocation2 + $0x1b8] sm:$0xff] }
  0x43   : > { %2516 = vmatprep.subr.bf16.mxu0 %v2515_v33  ;;  %2544 = vmatprep.subr.bf16.mxu1 %v2543_v42 }
  0x46   : > { %2518 = vmatpush3.bf16.msra.mxu0 %v2515_v33  ;;  %2546 = vmatpush3.bf16.msra.mxu1 %v2543_v42 }
  0x47   : > { %2520 = vmatprep.subr.bf16.mxu0 %v2519_v39  ;;  %2548 = vmatprep.subr.bf16.mxu1 %v2547_v46 }
  0x4a   : > { %2522 = vmatpush3.bf16.msra.mxu0 %v2519_v39  ;;  %2550 = vmatpush3.bf16.msra.mxu1 %v2547_v46 }
  0x4b   : > { %2552 = vmatprep.subr.bf16.mxu1 %v2551_v63  ;;  %2556 = vmatprep.subr.bf16.mxu0 %v2555_v3 }
  0x4d   : > { %2076 = vmatmul.mubr.f32.vlgmr.msra.gmra.mrb[0].mxu0 %v190_v45 }
  0x4e   : > { %2078 = vmatprep.mubr.f32.mxu0 %v191_v47  ;;  %2554 = vmatpush3.bf16.msra.mxu1 %v2551_v63 }
  0x4f   : > { %2558 = vmatpush3.bf16.msra.mxu0 %v2555_v3  ;;  %2588 = vmatprep.subr.bf16.mxu1 %v2587_v12 }
  0x50   : > { %2560 = vmatprep.subr.bf16.mxu0 %v2559_v5 }
  0x51   : > { %2079 = vmatmul.mubr.f32.gmra.mrb[2].mxu0 %v192_v48 }
  0x52   : > { %2081 = vmatprep.mubr.f32.mxu0 %v193_v49 }
  0x53   : > { %2562 = vmatpush3.bf16.msra.mxu0 %v2559_v5 }
  0x54   : > { %2564 = vmatprep.subr.bf16.mxu0 %v2563_v8 }
  0x55   : > { %2082 = vmatmul.mubr.f32.gmra.mrb[4].mxu0 %v194_v50 }
  0x56   : > { %2084 = vmatprep.mubr.f32.mxu0 %v195_v51 }
  0x57   : > { %2566 = vmatpush3.bf16.msra.mxu0 %v2563_v8  ;;  %v2583_v8 = vpack.c.bf16 %v591_v7, %v590_v6 }
  0x58   : > { %2568 = vmatprep.subr.bf16.mxu0 %v2567_v11 }
  0x59   : > { %2085 = vmatmul.mubr.f32.gmra.mrb[6].mxu0 %v196_v52 }
  0x5a   : > { %2087 = vmatprep.mubr.f32.mxu0 %v197_v53 }
  0x5b   : > { %2570 = vmatpush3.bf16.msra.mxu0 %v2567_v11  ;;  %v764_v11 = vld [vmem:[#allocation2 + $0x190] sm:$0xff] }
  0x5c   : > { %2572 = vmatprep.subr.bf16.mxu0 %v2571_v14 }
  0x5d   : > { %2088 = vmatmul.mubr.f32.gmra.mrb[8].mxu0 %v198_v54 }
  0x5e   : > { %2090 = vmatprep.mubr.f32.mxu0 %v199_v55 }
  0x5f   : > { %2574 = vmatpush3.bf16.msra.mxu0 %v2571_v14  ;;  %v2591_v14 = vpack.c.bf16 %v765_v13, %v764_v11 }
  0x60   : > { %2576 = vmatprep.subr.bf16.mxu0 %v2575_v17 }
  0x61   : > { %2091 = vmatmul.mubr.f32.gmra.mrb[10].mxu0 %v200_v56 }
  0x62   : > { %2093 = vmatprep.mubr.f32.mxu0 %v201_v57 }
  0x63   : > { %2578 = vmatpush3.bf16.msra.mxu0 %v2575_v17  ;;  %v2595_v17 = vpack.c.bf16 %v767_v16, %v766_v15  ;;  %v776_v15 = vld [vmem:[#allocation2 + $0x1f0] sm:$0xff]  ;;  %v777_v16 = vld [vmem:[#allocation2 + $0x1f8] sm:$0xff] }
  0x64   : > { %2580 = vmatprep.subr.bf16.mxu0 %v2579_v20 }
  0x65   : > { %2094 = vmatmul.mubr.f32.gmra.mrb[12].mxu0 %v202_v58 }
  0x66   : > { %2096 = vmatprep.mubr.f32.mxu0 %v203_v59 }
  0x67   : > { %2582 = vmatpush3.bf16.msra.mxu0 %v2579_v20  ;;  %v2599_v20 = vpack.c.bf16 %v769_v19, %v768_v18  ;;  %v948_v18 = vld [vmem:[#allocation2 + $0x200] sm:$0xff]  ;;  %v949_v19 = vld [vmem:[#allocation2 + $0x208] sm:$0xff] }
  0x68   : > { %2584 = vmatprep.subr.bf16.mxu0 %v2583_v8 }
  0x69   : > { %2097 = vmatmul.mubr.f32.gmra.mrb[14].mxu0 %v204_v60 }
  0x6b   : > { %2586 = vmatpush3.bf16.msra.mxu0 %v2583_v8 }
 0x120   : > { %v2077_v22 = vpop.f32.mrb[0].mxu0 }
 0x121   : > { %v300_v23 = vadd.f32 %v2077_v22, %v1770_v21  ;;  %v294_v24 = vpop.f32.mrb[1].mxu0  ;;  %v771_v22 = vld [vmem:[#allocation2 + $0x1c8] sm:$0xff] }
 0x122   : > { %v295_v25 = vadd.f32 %v1770_v21, %v294_v24  ;;  %v772_v24 = vld [vmem:[#allocation2 + $0x1d0] sm:$0xff] }
 0x123   : > { %v374_v28 = vmax.f32 %v300_v23, 0.0 }
 0x124   : > { %v2080_v26 = vpop.f32.mrb[2].mxu0  ;;  %v373_v27 = vmax.f32 %v295_v25, 0.0  ;;  %v773_v25 = vld [vmem:[#allocation2 + $0x1d8] sm:$0xff] }
 0x125   : > { %v310_v29 = vadd.f32 %v2080_v26, %v1770_v21  ;;  %v304_v30 = vpop.f32.mrb[3].mxu0  ;;  %v2607_v26 = vpack.c.bf16 %v773_v25, %v772_v24  ;;  %v952_v24 = vld [vmem:[#allocation2 + $0x220] sm:$0xff]  ;;  %v953_v25 = vld [vmem:[#allocation2 + $0x228] sm:$0xff] }
 0x126   : > { %v305_v31 = vadd.f32 %v1770_v21, %v304_v30  ;;  %2131 = vmatprep.mubr.f32.mxu1 %v373_v27  ;;  %v774_v27 = vld [vmem:[#allocation2 + $0x1e0] sm:$0xff] }
 0x127   : > { %2132 = vmatmul.mubr.f32.vlgmr.msra.gmra.mrb[0].mxu1 %v374_v28  ;;  %v376_v34 = vmax.f32 %v310_v29, 0.0  ;;  %v775_v28 = vld [vmem:[#allocation2 + $0x1e8] sm:$0xff]  ;;  %v1772_v30 = vld [vmem:[%s2959_s2 + $0x1] ss:$0 sm:$0xff] }
 0x128   : > { %v375_v32 = vmax.f32 %v305_v31, 0.0  ;;  %v2083_v33 = vpop.f32.mrb[4].mxu0  ;;  %2590 = vmatpush3.bf16.msra.mxu1 %v2587_v12  ;;  %v2611_v29 = vpack.c.bf16 %v775_v28, %v774_v27  ;;  %v954_v27 = vld [vmem:[#allocation2 + $0x230] sm:$0xff]  ;;  %v955_v28 = vld [vmem:[#allocation2 + $0x238] sm:$0xff] }
 0x129   : > { %v320_v35 = vadd.f32 %v2083_v33, %v1770_v21  ;;  %v314_v36 = vpop.f32.mrb[5].mxu0  ;;  %2592 = vmatprep.subr.bf16.mxu1 %v2591_v14 }
 0x12a   : > { %v315_v37 = vadd.f32 %v1770_v21, %v314_v36  ;;  %2134 = vmatprep.mubr.f32.mxu1 %v375_v32 }
 0x12b   : > { %2135 = vmatmul.mubr.f32.gmra.mrb[2].mxu1 %v376_v34  ;;  %v378_v40 = vmax.f32 %v320_v35, 0.0 }
 0x12c   : > { %v377_v38 = vmax.f32 %v315_v37, 0.0  ;;  %v2086_v39 = vpop.f32.mrb[6].mxu0  ;;  %2594 = vmatpush3.bf16.msra.mxu1 %v2591_v14 }
 0x12d   : > { %v330_v41 = vadd.f32 %v2086_v39, %v1770_v21  ;;  %v324_v42 = vpop.f32.mrb[7].mxu0  ;;  %2596 = vmatprep.subr.bf16.mxu1 %v2595_v17 }
 0x12e   : > { %v325_v43 = vadd.f32 %v1770_v21, %v324_v42  ;;  %2137 = vmatprep.mubr.f32.mxu1 %v377_v38 }
 0x12f   : > { %2138 = vmatmul.mubr.f32.gmra.mrb[4].mxu1 %v378_v40  ;;  %v380_v46 = vmax.f32 %v330_v41, 0.0 }
 0x130   : > { %v379_v44 = vmax.f32 %v325_v43, 0.0  ;;  %v2089_v45 = vpop.f32.mrb[8].mxu0  ;;  %2598 = vmatpush3.bf16.msra.mxu1 %v2595_v17  ;;  %v2615_v17 = vpack.c.bf16 %v777_v16, %v776_v15 }
 0x131   : > { %v340_v47 = vadd.f32 %v2089_v45, %v1770_v21  ;;  %v334_v48 = vpop.f32.mrb[9].mxu0  ;;  %2600 = vmatprep.subr.bf16.mxu1 %v2599_v20 }
 0x132   : > { %v335_v49 = vadd.f32 %v1770_v21, %v334_v48  ;;  %2140 = vmatprep.mubr.f32.mxu1 %v379_v44 }
 0x133   : > { %2141 = vmatmul.mubr.f32.gmra.mrb[6].mxu1 %v380_v46  ;;  %v382_v52 = vmax.f32 %v340_v47, 0.0 }
 0x134   : > { %v381_v50 = vmax.f32 %v335_v49, 0.0  ;;  %v2092_v51 = vpop.f32.mrb[10].mxu0  ;;  %2602 = vmatpush3.bf16.msra.mxu1 %v2599_v20  ;;  %v950_v20 = vld [vmem:[#allocation2 + $0x210] sm:$0xff] }
 0x135   : > { %v350_v53 = vadd.f32 %v2092_v51, %v1770_v21  ;;  %v344_v54 = vpop.f32.mrb[11].mxu0 }
 0x136   : > { %v345_v55 = vadd.f32 %v1770_v21, %v344_v54  ;;  %2143 = vmatprep.mubr.f32.mxu1 %v381_v50 }
 0x137   : > { %2144 = vmatmul.mubr.f32.gmra.mrb[8].mxu1 %v382_v52  ;;  %v384_v58 = vmax.f32 %v350_v53, 0.0 }
 0x138   : > { %v383_v56 = vmax.f32 %v345_v55, 0.0  ;;  %v2095_v57 = vpop.f32.mrb[12].mxu0 }
 0x139   : > { %v360_v59 = vadd.f32 %v2095_v57, %v1770_v21  ;;  %v354_v60 = vpop.f32.mrb[13].mxu0 }
 0x13a   : > { %v355_v61 = vadd.f32 %v1770_v21, %v354_v60  ;;  %2146 = vmatprep.mubr.f32.mxu1 %v383_v56 }
 0x13b   : > { %2147 = vmatmul.mubr.f32.gmra.mrb[10].mxu1 %v384_v58  ;;  %v386_v0 = vmax.f32 %v360_v59, 0.0 }
 0x13c   : > { %v385_v62 = vmax.f32 %v355_v61, 0.0  ;;  %v2098_v63 = vpop.f32.mrb[14].mxu0 }
 0x13d   : > { %v370_v1 = vadd.f32 %v2098_v63, %v1770_v21  ;;  %v364_v2 = vpop.f32.mrb[15].mxu0 }
 0x13e   : > { %v365_v3 = vadd.f32 %v1770_v21, %v364_v2  ;;  %2149 = vmatprep.mubr.f32.mxu1 %v385_v62  ;;  %v770_v21 = vld [vmem:[#allocation2 + $0x1c0] sm:$0xff] }
 0x13f   : > { %2150 = vmatmul.mubr.f32.gmra.mrb[12].mxu1 %v386_v0  ;;  %v388_v5 = vmax.f32 %v370_v1, 0.0  ;;  %v2603_v23 = vpack.c.bf16 %v771_v22, %v770_v21  ;;  %v2619_v21 = vpack.c.bf16 %v949_v19, %v948_v18  ;;  %v951_v22 = vld [vmem:[#allocation2 + $0x218] sm:$0xff] }
 0x140   : > { %v387_v4 = vmax.f32 %v365_v3, 0.0 }
 0x141   : > { %2604 = vmatprep.subr.bf16.mxu1 %v2603_v23  ;;  %2620 = vmatprep.subr.bf16.mxu0 %v2619_v21 }
 0x142   : > { %2152 = vmatprep.mubr.f32.mxu1 %v387_v4  ;;  %2606 = vmatpush3.bf16.msra.mxu1 %v2603_v23  ;;  %v2623_v23 = vpack.c.bf16 %v951_v22, %v950_v20 }
 0x143   : > { %2153 = vmatmul.mubr.f32.gmra.mrb[14].mxu1 %v388_v5  ;;  %2608 = vmatprep.subr.bf16.mxu1 %v2607_v26 }
 0x146   : > { %2610 = vmatpush3.bf16.msra.mxu1 %v2607_v26  ;;  %v2627_v26 = vpack.c.bf16 %v953_v25, %v952_v24  ;;  %v962_v24 = vld [vmem:[#allocation2 + $0x270] sm:$0xff]  ;;  %v963_v25 = vld [vmem:[#allocation2 + $0x278] sm:$0xff] }
 0x147   : > { %2612 = vmatprep.subr.bf16.mxu1 %v2611_v29 }
 0x14a   : > { %2614 = vmatpush3.bf16.msra.mxu1 %v2611_v29  ;;  %v2631_v29 = vpack.c.bf16 %v955_v28, %v954_v27  ;;  %v1134_v27 = vld [vmem:[#allocation2 + $0x280] sm:$0xff]  ;;  %v1135_v28 = vld [vmem:[#allocation2 + $0x288] sm:$0xff] }
 0x14b   : > { %2616 = vmatprep.subr.bf16.mxu1 %v2615_v17 }
 0x14e   : > { %2618 = vmatpush3.bf16.msra.mxu1 %v2615_v17 }
 0x1fa   : > { %v2133_v31 = vpop.f32.mrb[0].mxu1 }
 0x1fb   : > { %v486_v32 = vadd.f32 %v2133_v31, %v1772_v30  ;;  %v480_v33 = vpop.f32.mrb[1].mxu1  ;;  %v957_v31 = vld [vmem:[#allocation2 + $0x248] sm:$0xff] }
 0x1fc   : > { %v481_v34 = vadd.f32 %v1772_v30, %v480_v33  ;;  %v958_v33 = vld [vmem:[#allocation2 + $0x250] sm:$0xff] }
 0x1fd   : > { %v560_v37 = vmax.f32 %v486_v32, 0.0 }
 0x1fe   : > { %v559_v35 = vmax.f32 %v481_v34, 0.0  ;;  %v2136_v36 = vpop.f32.mrb[2].mxu1  ;;  %v959_v34 = vld [vmem:[#allocation2 + $0x258] sm:$0xff] }
 0x1ff   : > { %v496_v38 = vadd.f32 %v2136_v36, %v1772_v30  ;;  %v490_v39 = vpop.f32.mrb[3].mxu1  ;;  %v960_v36 = vld [vmem:[#allocation2 + $0x260] sm:$0xff] }
 0x200   : > { %v491_v40 = vadd.f32 %v1772_v30, %v490_v39  ;;  %2187 = vmatprep.mubr.f32.mxu0 %v559_v35  ;;  %v2639_v35 = vpack.c.bf16 %v959_v34, %v958_v33  ;;  %v1774_v39 = vld [vmem:[%s2959_s2 + $0x2] ss:$0 sm:$0xff]  ;;  %v1139_v34 = vld [vmem:[#allocation2 + $0x2a8] sm:$0xff] }
 0x201   : > { %2188 = vmatmul.mubr.f32.vlgmr.msra.gmra.mrb[16].mxu0 %v560_v37  ;;  %v562_v43 = vmax.f32 %v496_v38, 0.0  ;;  %v961_v37 = vld [vmem:[#allocation2 + $0x268] sm:$0xff]  ;;  %v1138_v33 = vld [vmem:[#allocation2 + $0x2a0] sm:$0xff] }
 0x202   : > { %v561_v41 = vmax.f32 %v491_v40, 0.0  ;;  %v2139_v42 = vpop.f32.mrb[4].mxu1  ;;  %2622 = vmatpush3.bf16.msra.mxu0 %v2619_v21  ;;  %v2643_v38 = vpack.c.bf16 %v961_v37, %v960_v36  ;;  %v1140_v36 = vld [vmem:[#allocation2 + $0x2b0] sm:$0xff]  ;;  %v1141_v37 = vld [vmem:[#allocation2 + $0x2b8] sm:$0xff] }
 0x203   : > { %v506_v44 = vadd.f32 %v2139_v42, %v1772_v30  ;;  %v500_v45 = vpop.f32.mrb[5].mxu1  ;;  %2624 = vmatprep.subr.bf16.mxu0 %v2623_v23 }
 0x204   : > { %v501_v46 = vadd.f32 %v1772_v30, %v500_v45  ;;  %2190 = vmatprep.mubr.f32.mxu0 %v561_v41 }
 0x205   : > { %2191 = vmatmul.mubr.f32.gmra.mrb[18].mxu0 %v562_v43  ;;  %v564_v49 = vmax.f32 %v506_v44, 0.0 }
 0x206   : > { %v563_v47 = vmax.f32 %v501_v46, 0.0  ;;  %v2142_v48 = vpop.f32.mrb[6].mxu1  ;;  %2626 = vmatpush3.bf16.msra.mxu0 %v2623_v23 }
 0x207   : > { %v516_v50 = vadd.f32 %v2142_v48, %v1772_v30  ;;  %v510_v51 = vpop.f32.mrb[7].mxu1  ;;  %2628 = vmatprep.subr.bf16.mxu0 %v2627_v26 }
 0x208   : > { %v511_v52 = vadd.f32 %v1772_v30, %v510_v51  ;;  %2193 = vmatprep.mubr.f32.mxu0 %v563_v47 }
 0x209   : > { %2194 = vmatmul.mubr.f32.gmra.mrb[20].mxu0 %v564_v49  ;;  %v566_v55 = vmax.f32 %v516_v50, 0.0 }
 0x20a   : > { %v565_v53 = vmax.f32 %v511_v52, 0.0  ;;  %v2145_v54 = vpop.f32.mrb[8].mxu1  ;;  %2630 = vmatpush3.bf16.msra.mxu0 %v2627_v26  ;;  %v2647_v26 = vpack.c.bf16 %v963_v25, %v962_v24 }
 0x20b   : > { %v526_v56 = vadd.f32 %v2145_v54, %v1772_v30  ;;  %v520_v57 = vpop.f32.mrb[9].mxu1  ;;  %2632 = vmatprep.subr.bf16.mxu0 %v2631_v29 }
 0x20c   : > { %v521_v58 = vadd.f32 %v1772_v30, %v520_v57  ;;  %2196 = vmatprep.mubr.f32.mxu0 %v565_v53 }
 0x20d   : > { %2197 = vmatmul.mubr.f32.gmra.mrb[22].mxu0 %v566_v55  ;;  %v568_v61 = vmax.f32 %v526_v56, 0.0 }
 0x20e   : > { %v567_v59 = vmax.f32 %v521_v58, 0.0  ;;  %v2148_v60 = vpop.f32.mrb[10].mxu1  ;;  %2634 = vmatpush3.bf16.msra.mxu0 %v2631_v29  ;;  %v1136_v29 = vld [vmem:[#allocation2 + $0x290] sm:$0xff] }
 0x20f   : > { %v536_v62 = vadd.f32 %v2148_v60, %v1772_v30  ;;  %v530_v63 = vpop.f32.mrb[11].mxu1 }
 0x210   : > { %v531_v0 = vadd.f32 %v1772_v30, %v530_v63  ;;  %2199 = vmatprep.mubr.f32.mxu0 %v567_v59 }
 0x211   : > { %2200 = vmatmul.mubr.f32.gmra.mrb[24].mxu0 %v568_v61  ;;  %v570_v3 = vmax.f32 %v536_v62, 0.0 }
 0x212   : > { %v569_v1 = vmax.f32 %v531_v0, 0.0  ;;  %v2151_v2 = vpop.f32.mrb[12].mxu1 }
 0x213   : > { %v546_v4 = vadd.f32 %v2151_v2, %v1772_v30  ;;  %v540_v5 = vpop.f32.mrb[13].mxu1 }
 0x214   : > { %v541_v6 = vadd.f32 %v1772_v30, %v540_v5  ;;  %2202 = vmatprep.mubr.f32.mxu0 %v569_v1 }
 0x215   : > { %2203 = vmatmul.mubr.f32.gmra.mrb[26].mxu0 %v570_v3  ;;  %v572_v9 = vmax.f32 %v546_v4, 0.0 }
 0x216   : > { %v571_v7 = vmax.f32 %v541_v6, 0.0  ;;  %v2154_v8 = vpop.f32.mrb[14].mxu1 }
 0x217   : > { %v556_v10 = vadd.f32 %v2154_v8, %v1772_v30  ;;  %v550_v11 = vpop.f32.mrb[15].mxu1 }
 0x218   : > { %v551_v12 = vadd.f32 %v1772_v30, %v550_v11  ;;  %2205 = vmatprep.mubr.f32.mxu0 %v571_v7  ;;  %v956_v30 = vld [vmem:[#allocation2 + $0x240] sm:$0xff] }
 0x219   : > { %2206 = vmatmul.mubr.f32.gmra.mrb[28].mxu0 %v572_v9  ;;  %v574_v14 = vmax.f32 %v556_v10, 0.0  ;;  %v2635_v32 = vpack.c.bf16 %v957_v31, %v956_v30  ;;  %v2651_v30 = vpack.c.bf16 %v1135_v28, %v1134_v27  ;;  %v1137_v31 = vld [vmem:[#allocation2 + $0x298] sm:$0xff] }
 0x21a   : > { %v573_v13 = vmax.f32 %v551_v12, 0.0 }
 0x21b   : > { %2636 = vmatprep.subr.bf16.mxu0 %v2635_v32  ;;  %2652 = vmatprep.subr.bf16.mxu1 %v2651_v30 }
 0x21c   : > { %2208 = vmatprep.mubr.f32.mxu0 %v573_v13  ;;  %2638 = vmatpush3.bf16.msra.mxu0 %v2635_v32  ;;  %v2655_v32 = vpack.c.bf16 %v1137_v31, %v1136_v29 }
 0x21d   : > { %2209 = vmatmul.mubr.f32.gmra.mrb[30].mxu0 %v574_v14  ;;  %2640 = vmatprep.subr.bf16.mxu0 %v2639_v35 }
 0x220   : > { %2642 = vmatpush3.bf16.msra.mxu0 %v2639_v35  ;;  %v2659_v35 = vpack.c.bf16 %v1139_v34, %v1138_v33  ;;  %v1148_v33 = vld [vmem:[#allocation2 + $0x2f0] sm:$0xff]  ;;  %v1149_v34 = vld [vmem:[#allocation2 + $0x2f8] sm:$0xff] }
 0x221   : > { %2644 = vmatprep.subr.bf16.mxu0 %v2643_v38 }
 0x224   : > { %2646 = vmatpush3.bf16.msra.mxu0 %v2643_v38  ;;  %v2663_v38 = vpack.c.bf16 %v1141_v37, %v1140_v36  ;;  %v1320_v36 = vld [vmem:[#allocation2 + $0x300] sm:$0xff]  ;;  %v1321_v37 = vld [vmem:[#allocation2 + $0x308] sm:$0xff] }
 0x225   : > { %2648 = vmatprep.subr.bf16.mxu0 %v2647_v26 }
 0x228   : > { %2650 = vmatpush3.bf16.msra.mxu0 %v2647_v26 }
 0x2d4   : > { %v2189_v40 = vpop.f32.mrb[16].mxu0 }
 0x2d5   : > { %v672_v41 = vadd.f32 %v2189_v40, %v1774_v39  ;;  %v666_v42 = vpop.f32.mrb[17].mxu0  ;;  %v1143_v40 = vld [vmem:[#allocation2 + $0x2c8] sm:$0xff] }
 0x2d6   : > { %v667_v43 = vadd.f32 %v1774_v39, %v666_v42  ;;  %v1144_v42 = vld [vmem:[#allocation2 + $0x2d0] sm:$0xff] }
 0x2d7   : > { %v746_v46 = vmax.f32 %v672_v41, 0.0 }
 0x2d8   : > { %v745_v44 = vmax.f32 %v667_v43, 0.0  ;;  %v2192_v45 = vpop.f32.mrb[18].mxu0  ;;  %v1145_v43 = vld [vmem:[#allocation2 + $0x2d8] sm:$0xff] }
 0x2d9   : > { %v682_v47 = vadd.f32 %v2192_v45, %v1774_v39  ;;  %v676_v48 = vpop.f32.mrb[19].mxu0  ;;  %v1146_v45 = vld [vmem:[#allocation2 + $0x2e0] sm:$0xff] }
 0x2da   : > { %v677_v49 = vadd.f32 %v1774_v39, %v676_v48  ;;  %2243 = vmatprep.mubr.f32.mxu1 %v745_v44  ;;  %v2671_v44 = vpack.c.bf16 %v1145_v43, %v1144_v42  ;;  %v1776_v48 = vld [vmem:[%s2959_s2 + $0x3] ss:$0 sm:$0xff]  ;;  %v1325_v43 = vld [vmem:[#allocation2 + $0x328] sm:$0xff] }
 0x2db   : > { %2244 = vmatmul.mubr.f32.vlgmr.msra.gmra.mrb[16].mxu1 %v746_v46  ;;  %v748_v52 = vmax.f32 %v682_v47, 0.0  ;;  %v1147_v46 = vld [vmem:[#allocation2 + $0x2e8] sm:$0xff]  ;;  %v1324_v42 = vld [vmem:[#allocation2 + $0x320] sm:$0xff] }
 0x2dc   : > { %v747_v50 = vmax.f32 %v677_v49, 0.0  ;;  %v2195_v51 = vpop.f32.mrb[20].mxu0  ;;  %2654 = vmatpush3.bf16.msra.mxu1 %v2651_v30  ;;  %v2675_v47 = vpack.c.bf16 %v1147_v46, %v1146_v45  ;;  %v1326_v45 = vld [vmem:[#allocation2 + $0x330] sm:$0xff]  ;;  %v1327_v46 = vld [vmem:[#allocation2 + $0x338] sm:$0xff] }
 0x2dd   : > { %v692_v53 = vadd.f32 %v2195_v51, %v1774_v39  ;;  %v686_v54 = vpop.f32.mrb[21].mxu0  ;;  %2656 = vmatprep.subr.bf16.mxu1 %v2655_v32 }
 0x2de   : > { %v687_v55 = vadd.f32 %v1774_v39, %v686_v54  ;;  %2246 = vmatprep.mubr.f32.mxu1 %v747_v50 }
 0x2df   : > { %2247 = vmatmul.mubr.f32.gmra.mrb[18].mxu1 %v748_v52  ;;  %v750_v58 = vmax.f32 %v692_v53, 0.0 }
 0x2e0   : > { %v749_v56 = vmax.f32 %v687_v55, 0.0  ;;  %v2198_v57 = vpop.f32.mrb[22].mxu0  ;;  %2658 = vmatpush3.bf16.msra.mxu1 %v2655_v32 }
 0x2e1   : > { %v702_v59 = vadd.f32 %v2198_v57, %v1774_v39  ;;  %v696_v60 = vpop.f32.mrb[23].mxu0  ;;  %2660 = vmatprep.subr.bf16.mxu1 %v2659_v35 }
 0x2e2   : > { %v697_v61 = vadd.f32 %v1774_v39, %v696_v60  ;;  %2249 = vmatprep.mubr.f32.mxu1 %v749_v56 }
 0x2e3   : > { %2250 = vmatmul.mubr.f32.gmra.mrb[20].mxu1 %v750_v58  ;;  %v752_v0 = vmax.f32 %v702_v59, 0.0 }
 0x2e4   : > { %v751_v62 = vmax.f32 %v697_v61, 0.0  ;;  %v2201_v63 = vpop.f32.mrb[24].mxu0  ;;  %2662 = vmatpush3.bf16.msra.mxu1 %v2659_v35  ;;  %v2679_v35 = vpack.c.bf16 %v1149_v34, %v1148_v33 }
 0x2e5   : > { %v712_v1 = vadd.f32 %v2201_v63, %v1774_v39  ;;  %v706_v2 = vpop.f32.mrb[25].mxu0  ;;  %2664 = vmatprep.subr.bf16.mxu1 %v2663_v38 }
 0x2e6   : > { %v707_v3 = vadd.f32 %v1774_v39, %v706_v2  ;;  %2252 = vmatprep.mubr.f32.mxu1 %v751_v62 }
 0x2e7   : > { %2253 = vmatmul.mubr.f32.gmra.mrb[22].mxu1 %v752_v0  ;;  %v754_v6 = vmax.f32 %v712_v1, 0.0 }
 0x2e8   : > { %v753_v4 = vmax.f32 %v707_v3, 0.0  ;;  %v2204_v5 = vpop.f32.mrb[26].mxu0  ;;  %2666 = vmatpush3.bf16.msra.mxu1 %v2663_v38  ;;  %v1322_v38 = vld [vmem:[#allocation2 + $0x310] sm:$0xff] }
 0x2e9   : > { %v722_v7 = vadd.f32 %v2204_v5, %v1774_v39  ;;  %v716_v8 = vpop.f32.mrb[27].mxu0 }
 0x2ea   : > { %v717_v9 = vadd.f32 %v1774_v39, %v716_v8  ;;  %2255 = vmatprep.mubr.f32.mxu1 %v753_v4 }
 0x2eb   : > { %2256 = vmatmul.mubr.f32.gmra.mrb[24].mxu1 %v754_v6  ;;  %v756_v12 = vmax.f32 %v722_v7, 0.0 }
 0x2ec   : > { %v755_v10 = vmax.f32 %v717_v9, 0.0  ;;  %v2207_v11 = vpop.f32.mrb[28].mxu0 }
 0x2ed   : > { %v732_v13 = vadd.f32 %v2207_v11, %v1774_v39  ;;  %v726_v14 = vpop.f32.mrb[29].mxu0 }
 0x2ee   : > { %v727_v15 = vadd.f32 %v1774_v39, %v726_v14  ;;  %2258 = vmatprep.mubr.f32.mxu1 %v755_v10 }
 0x2ef   : > { %2259 = vmatmul.mubr.f32.gmra.mrb[26].mxu1 %v756_v12  ;;  %v758_v18 = vmax.f32 %v732_v13, 0.0 }
 0x2f0   : > { %v757_v16 = vmax.f32 %v727_v15, 0.0  ;;  %v2210_v17 = vpop.f32.mrb[30].mxu0 }
 0x2f1   : > { %v742_v19 = vadd.f32 %v2210_v17, %v1774_v39  ;;  %v736_v20 = vpop.f32.mrb[31].mxu0 }
 0x2f2   : > { %v737_v21 = vadd.f32 %v1774_v39, %v736_v20  ;;  %2261 = vmatprep.mubr.f32.mxu1 %v757_v16  ;;  %v1142_v39 = vld [vmem:[#allocation2 + $0x2c0] sm:$0xff] }
 0x2f3   : > { %2262 = vmatmul.mubr.f32.gmra.mrb[28].mxu1 %v758_v18  ;;  %v760_v23 = vmax.f32 %v742_v19, 0.0  ;;  %v2667_v41 = vpack.c.bf16 %v1143_v40, %v1142_v39  ;;  %v2683_v39 = vpack.c.bf16 %v1321_v37, %v1320_v36  ;;  %v1323_v40 = vld [vmem:[#allocation2 + $0x318] sm:$0xff] }
 0x2f4   : > { %v759_v22 = vmax.f32 %v737_v21, 0.0 }
 0x2f5   : > { %2668 = vmatprep.subr.bf16.mxu1 %v2667_v41  ;;  %2684 = vmatprep.subr.bf16.mxu0 %v2683_v39 }
 0x2f6   : > { %2264 = vmatprep.mubr.f32.mxu1 %v759_v22  ;;  %2670 = vmatpush3.bf16.msra.mxu1 %v2667_v41  ;;  %v2687_v41 = vpack.c.bf16 %v1323_v40, %v1322_v38 }
 0x2f7   : > { %2265 = vmatmul.mubr.f32.gmra.mrb[30].mxu1 %v760_v23  ;;  %2672 = vmatprep.subr.bf16.mxu1 %v2671_v44 }
 0x2fa   : > { %2674 = vmatpush3.bf16.msra.mxu1 %v2671_v44  ;;  %v2691_v44 = vpack.c.bf16 %v1325_v43, %v1324_v42  ;;  %v1334_v42 = vld [vmem:[#allocation2 + $0x370] sm:$0xff]  ;;  %v1335_v43 = vld [vmem:[#allocation2 + $0x378] sm:$0xff] }
 0x2fb   : > { %2676 = vmatprep.subr.bf16.mxu1 %v2675_v47 }
 0x2fe   : > { %2678 = vmatpush3.bf16.msra.mxu1 %v2675_v47  ;;  %v2695_v47 = vpack.c.bf16 %v1327_v46, %v1326_v45  ;;  %v1506_v45 = vld [vmem:[#allocation2 + $0x380] sm:$0xff]  ;;  %v1507_v46 = vld [vmem:[#allocation2 + $0x388] sm:$0xff] }
 0x2ff   : > { %2680 = vmatprep.subr.bf16.mxu1 %v2679_v35 }
 0x302   : > { %2682 = vmatpush3.bf16.msra.mxu1 %v2679_v35 }
 0x3ae   : > { %v2245_v49 = vpop.f32.mrb[16].mxu1 }
 0x3af   : > { %v858_v50 = vadd.f32 %v2245_v49, %v1776_v48  ;;  %v852_v51 = vpop.f32.mrb[17].mxu1  ;;  %v1329_v49 = vld [vmem:[#allocation2 + $0x348] sm:$0xff] }
 0x3b0   : > { %v853_v52 = vadd.f32 %v1776_v48, %v852_v51  ;;  %v1330_v51 = vld [vmem:[#allocation2 + $0x350] sm:$0xff] }
 0x3b1   : > { %v932_v55 = vmax.f32 %v858_v50, 0.0 }
 0x3b2   : > { %v931_v53 = vmax.f32 %v853_v52, 0.0  ;;  %v2248_v54 = vpop.f32.mrb[18].mxu1  ;;  %v1331_v52 = vld [vmem:[#allocation2 + $0x358] sm:$0xff] }
 0x3b3   : > { %v868_v56 = vadd.f32 %v2248_v54, %v1776_v48  ;;  %v862_v57 = vpop.f32.mrb[19].mxu1  ;;  %v1332_v54 = vld [vmem:[#allocation2 + $0x360] sm:$0xff] }
 0x3b4   : > { %v863_v58 = vadd.f32 %v1776_v48, %v862_v57  ;;  %2299 = vmatprep.mubr.f32.mxu0 %v931_v53  ;;  %v2703_v53 = vpack.c.bf16 %v1331_v52, %v1330_v51  ;;  %v1778_v57 = vld [vmem:[%s2959_s2 + $0x4] ss:$0 sm:$0xff]  ;;  %v1511_v52 = vld [vmem:[#allocation2 + $0x3a8] sm:$0xff] }
 0x3b5   : > { %2300 = vmatmul.mubr.f32.vlgmr.msra.gmra.mrb[32].mxu0 %v932_v55  ;;  %v934_v61 = vmax.f32 %v868_v56, 0.0  ;;  %v1333_v55 = vld [vmem:[#allocation2 + $0x368] sm:$0xff]  ;;  %v1510_v51 = vld [vmem:[#allocation2 + $0x3a0] sm:$0xff] }
 0x3b6   : > { %v933_v59 = vmax.f32 %v863_v58, 0.0  ;;  %v2251_v60 = vpop.f32.mrb[20].mxu1  ;;  %2686 = vmatpush3.bf16.msra.mxu0 %v2683_v39  ;;  %v2707_v56 = vpack.c.bf16 %v1333_v55, %v1332_v54  ;;  %v1512_v54 = vld [vmem:[#allocation2 + $0x3b0] sm:$0xff]  ;;  %v1513_v55 = vld [vmem:[#allocation2 + $0x3b8] sm:$0xff] }
 0x3b7   : > { %v878_v62 = vadd.f32 %v2251_v60, %v1776_v48  ;;  %v872_v63 = vpop.f32.mrb[21].mxu1  ;;  %2688 = vmatprep.subr.bf16.mxu0 %v2687_v41 }
 0x3b8   : > { %v873_v0 = vadd.f32 %v1776_v48, %v872_v63  ;;  %2302 = vmatprep.mubr.f32.mxu0 %v933_v59 }
 0x3b9   : > { %2303 = vmatmul.mubr.f32.gmra.mrb[34].mxu0 %v934_v61  ;;  %v936_v3 = vmax.f32 %v878_v62, 0.0 }
 0x3ba   : > { %v935_v1 = vmax.f32 %v873_v0, 0.0  ;;  %v2254_v2 = vpop.f32.mrb[22].mxu1  ;;  %2690 = vmatpush3.bf16.msra.mxu0 %v2687_v41 }
 0x3bb   : > { %v888_v4 = vadd.f32 %v2254_v2, %v1776_v48  ;;  %v882_v5 = vpop.f32.mrb[23].mxu1  ;;  %2692 = vmatprep.subr.bf16.mxu0 %v2691_v44 }
 0x3bc   : > { %v883_v6 = vadd.f32 %v1776_v48, %v882_v5  ;;  %2305 = vmatprep.mubr.f32.mxu0 %v935_v1 }
 0x3bd   : > { %2306 = vmatmul.mubr.f32.gmra.mrb[36].mxu0 %v936_v3  ;;  %v938_v9 = vmax.f32 %v888_v4, 0.0 }
 0x3be   : > { %v937_v7 = vmax.f32 %v883_v6, 0.0  ;;  %v2257_v8 = vpop.f32.mrb[24].mxu1  ;;  %2694 = vmatpush3.bf16.msra.mxu0 %v2691_v44  ;;  %v2711_v44 = vpack.c.bf16 %v1335_v43, %v1334_v42 }
 0x3bf   : > { %v898_v10 = vadd.f32 %v2257_v8, %v1776_v48  ;;  %v892_v11 = vpop.f32.mrb[25].mxu1  ;;  %2696 = vmatprep.subr.bf16.mxu0 %v2695_v47 }
 0x3c0   : > { %v893_v12 = vadd.f32 %v1776_v48, %v892_v11  ;;  %2308 = vmatprep.mubr.f32.mxu0 %v937_v7 }
 0x3c1   : > { %2309 = vmatmul.mubr.f32.gmra.mrb[38].mxu0 %v938_v9  ;;  %v940_v15 = vmax.f32 %v898_v10, 0.0 }
 0x3c2   : > { %v939_v13 = vmax.f32 %v893_v12, 0.0  ;;  %v2260_v14 = vpop.f32.mrb[26].mxu1  ;;  %2698 = vmatpush3.bf16.msra.mxu0 %v2695_v47  ;;  %v1508_v47 = vld [vmem:[#allocation2 + $0x390] sm:$0xff] }
 0x3c3   : > { %v908_v16 = vadd.f32 %v2260_v14, %v1776_v48  ;;  %v902_v17 = vpop.f32.mrb[27].mxu1 }
 0x3c4   : > { %v903_v18 = vadd.f32 %v1776_v48, %v902_v17  ;;  %2311 = vmatprep.mubr.f32.mxu0 %v939_v13 }
 0x3c5   : > { %2312 = vmatmul.mubr.f32.gmra.mrb[40].mxu0 %v940_v15  ;;  %v942_v21 = vmax.f32 %v908_v16, 0.0 }
 0x3c6   : > { %v941_v19 = vmax.f32 %v903_v18, 0.0  ;;  %v2263_v20 = vpop.f32.mrb[28].mxu1 }
 0x3c7   : > { %v918_v22 = vadd.f32 %v2263_v20, %v1776_v48  ;;  %v912_v23 = vpop.f32.mrb[29].mxu1 }
 0x3c8   : > { %v913_v24 = vadd.f32 %v1776_v48, %v912_v23  ;;  %2314 = vmatprep.mubr.f32.mxu0 %v941_v19 }
 0x3c9   : > { %2315 = vmatmul.mubr.f32.gmra.mrb[42].mxu0 %v942_v21  ;;  %v944_v27 = vmax.f32 %v918_v22, 0.0 }
 0x3ca   : > { %v943_v25 = vmax.f32 %v913_v24, 0.0  ;;  %v2266_v26 = vpop.f32.mrb[30].mxu1 }
 0x3cb   : > { %v928_v28 = vadd.f32 %v2266_v26, %v1776_v48  ;;  %v922_v29 = vpop.f32.mrb[31].mxu1 }
 0x3cc   : > { %v923_v30 = vadd.f32 %v1776_v48, %v922_v29  ;;  %2317 = vmatprep.mubr.f32.mxu0 %v943_v25  ;;  %v1328_v48 = vld [vmem:[#allocation2 + $0x340] sm:$0xff] }
 0x3cd   : > { %2318 = vmatmul.mubr.f32.gmra.mrb[44].mxu0 %v944_v27  ;;  %v946_v32 = vmax.f32 %v928_v28, 0.0  ;;  %v2699_v50 = vpack.c.bf16 %v1329_v49, %v1328_v48  ;;  %v2715_v48 = vpack.c.bf16 %v1507_v46, %v1506_v45  ;;  %v1509_v49 = vld [vmem:[#allocation2 + $0x398] sm:$0xff] }
 0x3ce   : > { %v945_v31 = vmax.f32 %v923_v30, 0.0 }
 0x3cf   : > { %2700 = vmatprep.subr.bf16.mxu0 %v2699_v50  ;;  %2716 = vmatprep.subr.bf16.mxu1 %v2715_v48 }
 0x3d0   : > { %2320 = vmatprep.mubr.f32.mxu0 %v945_v31  ;;  %2702 = vmatpush3.bf16.msra.mxu0 %v2699_v50  ;;  %v2719_v50 = vpack.c.bf16 %v1509_v49, %v1508_v47 }
 0x3d1   : > { %2321 = vmatmul.mubr.f32.gmra.mrb[46].mxu0 %v946_v32  ;;  %2704 = vmatprep.subr.bf16.mxu0 %v2703_v53 }
 0x3d4   : > { %2706 = vmatpush3.bf16.msra.mxu0 %v2703_v53  ;;  %v2723_v53 = vpack.c.bf16 %v1511_v52, %v1510_v51  ;;  %v1520_v51 = vld [vmem:[#allocation2 + $0x3f0] sm:$0xff]  ;;  %v1521_v52 = vld [vmem:[#allocation2 + $0x3f8] sm:$0xff] }
 0x3d5   : > { %2708 = vmatprep.subr.bf16.mxu0 %v2707_v56 }
 0x3d8   : > { %2710 = vmatpush3.bf16.msra.mxu0 %v2707_v56  ;;  %v2727_v56 = vpack.c.bf16 %v1513_v55, %v1512_v54  ;;  %v1782_v54 = vld [vmem:[%s2959_s2 + $0x6] ss:$0 sm:$0xff] }
 0x3d9   : > { %2712 = vmatprep.subr.bf16.mxu0 %v2711_v44 }
 0x3dc   : > { %2714 = vmatpush3.bf16.msra.mxu0 %v2711_v44 }
 0x488   : > { %v2301_v58 = vpop.f32.mrb[32].mxu0 }
 0x489   : > { %v1044_v59 = vadd.f32 %v2301_v58, %v1778_v57  ;;  %v1038_v60 = vpop.f32.mrb[33].mxu0  ;;  %v1515_v58 = vld [vmem:[#allocation2 + $0x3c8] sm:$0xff] }
 0x48a   : > { %v1039_v61 = vadd.f32 %v1778_v57, %v1038_v60  ;;  %v1516_v60 = vld [vmem:[#allocation2 + $0x3d0] sm:$0xff] }
 0x48b   : > { %v1118_v0 = vmax.f32 %v1044_v59, 0.0 }
 0x48c   : > { %v1117_v62 = vmax.f32 %v1039_v61, 0.0  ;;  %v2304_v63 = vpop.f32.mrb[34].mxu0  ;;  %v1517_v61 = vld [vmem:[#allocation2 + $0x3d8] sm:$0xff] }
 0x48d   : > { %v1054_v1 = vadd.f32 %v2304_v63, %v1778_v57  ;;  %v1048_v2 = vpop.f32.mrb[35].mxu0  ;;  %v1518_v63 = vld [vmem:[#allocation2 + $0x3e0] sm:$0xff] }
 0x48e   : > { %v1049_v3 = vadd.f32 %v1778_v57, %v1048_v2  ;;  %2355 = vmatprep.mubr.f32.mxu1 %v1117_v62  ;;  %v2735_v62 = vpack.c.bf16 %v1517_v61, %v1516_v60  ;;  %v1780_v2 = vld [vmem:[%s2959_s2 + $0x5] ss:$0 sm:$0xff] }
 0x48f   : > { %2356 = vmatmul.mubr.f32.vlgmr.msra.gmra.mrb[32].mxu1 %v1118_v0  ;;  %v1120_v6 = vmax.f32 %v1054_v1, 0.0  ;;  %v1519_v0 = vld [vmem:[#allocation2 + $0x3e8] sm:$0xff] }
 0x490   : > { %v1119_v4 = vmax.f32 %v1049_v3, 0.0  ;;  %v2307_v5 = vpop.f32.mrb[36].mxu0  ;;  %2718 = vmatpush3.bf16.msra.mxu1 %v2715_v48  ;;  %v2739_v1 = vpack.c.bf16 %v1519_v0, %v1518_v63 }
 0x491   : > { %v1064_v7 = vadd.f32 %v2307_v5, %v1778_v57  ;;  %v1058_v8 = vpop.f32.mrb[37].mxu0  ;;  %2720 = vmatprep.subr.bf16.mxu1 %v2719_v50 }
 0x492   : > { %v1059_v9 = vadd.f32 %v1778_v57, %v1058_v8  ;;  %2358 = vmatprep.mubr.f32.mxu1 %v1119_v4 }
 0x493   : > { %2359 = vmatmul.mubr.f32.gmra.mrb[34].mxu1 %v1120_v6  ;;  %v1122_v12 = vmax.f32 %v1064_v7, 0.0 }
 0x494   : > { %v1121_v10 = vmax.f32 %v1059_v9, 0.0  ;;  %v2310_v11 = vpop.f32.mrb[38].mxu0  ;;  %2722 = vmatpush3.bf16.msra.mxu1 %v2719_v50 }
 0x495   : > { %v1074_v13 = vadd.f32 %v2310_v11, %v1778_v57  ;;  %v1068_v14 = vpop.f32.mrb[39].mxu0  ;;  %2724 = vmatprep.subr.bf16.mxu1 %v2723_v53 }
 0x496   : > { %v1069_v15 = vadd.f32 %v1778_v57, %v1068_v14  ;;  %2361 = vmatprep.mubr.f32.mxu1 %v1121_v10 }
 0x497   : > { %2362 = vmatmul.mubr.f32.gmra.mrb[36].mxu1 %v1122_v12  ;;  %v1124_v18 = vmax.f32 %v1074_v13, 0.0 }
 0x498   : > { %v1123_v16 = vmax.f32 %v1069_v15, 0.0  ;;  %v2313_v17 = vpop.f32.mrb[40].mxu0  ;;  %2726 = vmatpush3.bf16.msra.mxu1 %v2723_v53  ;;  %v2743_v53 = vpack.c.bf16 %v1521_v52, %v1520_v51 }
 0x499   : > { %v1084_v19 = vadd.f32 %v2313_v17, %v1778_v57  ;;  %v1078_v20 = vpop.f32.mrb[41].mxu0  ;;  %2728 = vmatprep.subr.bf16.mxu1 %v2727_v56 }
 0x49a   : > { %v1079_v21 = vadd.f32 %v1778_v57, %v1078_v20  ;;  %2364 = vmatprep.mubr.f32.mxu1 %v1123_v16 }
 0x49b   : > { %2365 = vmatmul.mubr.f32.gmra.mrb[38].mxu1 %v1124_v18  ;;  %v1126_v24 = vmax.f32 %v1084_v19, 0.0 }
 0x49c   : > { %v1125_v22 = vmax.f32 %v1079_v21, 0.0  ;;  %v2316_v23 = vpop.f32.mrb[42].mxu0  ;;  %2730 = vmatpush3.bf16.msra.mxu1 %v2727_v56 }
 0x49d   : > { %v1094_v25 = vadd.f32 %v2316_v23, %v1778_v57  ;;  %v1088_v26 = vpop.f32.mrb[43].mxu0 }
 0x49e   : > { %v1089_v27 = vadd.f32 %v1778_v57, %v1088_v26  ;;  %2367 = vmatprep.mubr.f32.mxu1 %v1125_v22 }
 0x49f   : > { %2368 = vmatmul.mubr.f32.gmra.mrb[40].mxu1 %v1126_v24  ;;  %v1128_v30 = vmax.f32 %v1094_v25, 0.0 }
 0x4a0   : > { %v1127_v28 = vmax.f32 %v1089_v27, 0.0  ;;  %v2319_v29 = vpop.f32.mrb[44].mxu0 }
 0x4a1   : > { %v1104_v31 = vadd.f32 %v2319_v29, %v1778_v57  ;;  %v1098_v32 = vpop.f32.mrb[45].mxu0 }
 0x4a2   : > { %v1099_v33 = vadd.f32 %v1778_v57, %v1098_v32  ;;  %2370 = vmatprep.mubr.f32.mxu1 %v1127_v28 }
 0x4a3   : > { %2371 = vmatmul.mubr.f32.gmra.mrb[42].mxu1 %v1128_v30  ;;  %v1130_v36 = vmax.f32 %v1104_v31, 0.0 }
 0x4a4   : > { %v1129_v34 = vmax.f32 %v1099_v33, 0.0  ;;  %v2322_v35 = vpop.f32.mrb[46].mxu0 }
 0x4a5   : > { %v1114_v37 = vadd.f32 %v2322_v35, %v1778_v57  ;;  %v1108_v38 = vpop.f32.mrb[47].mxu0 }
 0x4a6   : > { %v1109_v39 = vadd.f32 %v1778_v57, %v1108_v38  ;;  %2373 = vmatprep.mubr.f32.mxu1 %v1129_v34  ;;  %v1514_v57 = vld [vmem:[#allocation2 + $0x3c0] sm:$0xff] }
 0x4a7   : > { %2374 = vmatmul.mubr.f32.gmra.mrb[44].mxu1 %v1130_v36  ;;  %v1132_v41 = vmax.f32 %v1114_v37, 0.0  ;;  %v2731_v59 = vpack.c.bf16 %v1515_v58, %v1514_v57 }
 0x4a8   : > { %v1131_v40 = vmax.f32 %v1109_v39, 0.0 }
 0x4a9   : > { %2732 = vmatprep.subr.bf16.mxu1 %v2731_v59 }
 0x4aa   : > { %2376 = vmatprep.mubr.f32.mxu1 %v1131_v40  ;;  %2734 = vmatpush3.bf16.msra.mxu1 %v2731_v59 }
 0x4ab   : > { %2377 = vmatmul.mubr.f32.gmra.mrb[46].mxu1 %v1132_v41  ;;  %2736 = vmatprep.subr.bf16.mxu1 %v2735_v62 }
 0x4ae   : > { %2738 = vmatpush3.bf16.msra.mxu1 %v2735_v62 }
 0x4af   : > { %2740 = vmatprep.subr.bf16.mxu1 %v2739_v1 }
 0x4b2   : > { %2742 = vmatpush3.bf16.msra.mxu1 %v2739_v1 }
 0x4b3   : > { %2744 = vmatprep.subr.bf16.mxu1 %v2743_v53 }
 0x4b6   : > { %2746 = vmatpush3.bf16.msra.mxu1 %v2743_v53 }
 0x562   : > { %v2357_v3 = vpop.f32.mrb[32].mxu1 }
 0x563   : > { %v1230_v4 = vadd.f32 %v2357_v3, %v1780_v2  ;;  %v1224_v5 = vpop.f32.mrb[33].mxu1 }
 0x564   : > { %v1225_v6 = vadd.f32 %v1780_v2, %v1224_v5 }
 0x565   : > { %v1304_v9 = vmax.f32 %v1230_v4, 0.0 }
 0x566   : > { %v1303_v7 = vmax.f32 %v1225_v6, 0.0  ;;  %v2360_v8 = vpop.f32.mrb[34].mxu1 }
 0x567   : > { %v1240_v10 = vadd.f32 %v2360_v8, %v1780_v2  ;;  %v1234_v11 = vpop.f32.mrb[35].mxu1 }
 0x568   : > { %v1235_v12 = vadd.f32 %v1780_v2, %v1234_v11  ;;  %2411 = vmatprep.mubr.f32.mxu0 %v1303_v7 }
 0x569   : > { %2412 = vmatmul.mubr.f32.vlgmr.msra.gmra.mrb[48].mxu0 %v1304_v9  ;;  %v1306_v15 = vmax.f32 %v1240_v10, 0.0 }
 0x56a   : > { %v1305_v13 = vmax.f32 %v1235_v12, 0.0  ;;  %v2363_v14 = vpop.f32.mrb[36].mxu1 }
 0x56b   : > { %v1250_v16 = vadd.f32 %v2363_v14, %v1780_v2  ;;  %v1244_v17 = vpop.f32.mrb[37].mxu1 }
 0x56c   : > { %v1245_v18 = vadd.f32 %v1780_v2, %v1244_v17  ;;  %2414 = vmatprep.mubr.f32.mxu0 %v1305_v13 }
 0x56d   : > { %2415 = vmatmul.mubr.f32.gmra.mrb[50].mxu0 %v1306_v15  ;;  %v1308_v21 = vmax.f32 %v1250_v16, 0.0 }
 0x56e   : > { %v1307_v19 = vmax.f32 %v1245_v18, 0.0  ;;  %v2366_v20 = vpop.f32.mrb[38].mxu1 }
 0x56f   : > { %v1260_v22 = vadd.f32 %v2366_v20, %v1780_v2  ;;  %v1254_v23 = vpop.f32.mrb[39].mxu1 }
 0x570   : > { %v1255_v24 = vadd.f32 %v1780_v2, %v1254_v23  ;;  %2417 = vmatprep.mubr.f32.mxu0 %v1307_v19 }
 0x571   : > { %2418 = vmatmul.mubr.f32.gmra.mrb[52].mxu0 %v1308_v21  ;;  %v1310_v27 = vmax.f32 %v1260_v22, 0.0 }
 0x572   : > { %v1309_v25 = vmax.f32 %v1255_v24, 0.0  ;;  %v2369_v26 = vpop.f32.mrb[40].mxu1 }
 0x573   : > { %v1270_v28 = vadd.f32 %v2369_v26, %v1780_v2  ;;  %v1264_v29 = vpop.f32.mrb[41].mxu1 }
 0x574   : > { %v1265_v30 = vadd.f32 %v1780_v2, %v1264_v29  ;;  %2420 = vmatprep.mubr.f32.mxu0 %v1309_v25 }
 0x575   : > { %2421 = vmatmul.mubr.f32.gmra.mrb[54].mxu0 %v1310_v27  ;;  %v1312_v33 = vmax.f32 %v1270_v28, 0.0 }
 0x576   : > { %v1311_v31 = vmax.f32 %v1265_v30, 0.0  ;;  %v2372_v32 = vpop.f32.mrb[42].mxu1 }
 0x577   : > { %v1280_v34 = vadd.f32 %v2372_v32, %v1780_v2  ;;  %v1274_v35 = vpop.f32.mrb[43].mxu1 }
 0x578   : > { %v1275_v36 = vadd.f32 %v1780_v2, %v1274_v35  ;;  %2423 = vmatprep.mubr.f32.mxu0 %v1311_v31 }
 0x579   : > { %2424 = vmatmul.mubr.f32.gmra.mrb[56].mxu0 %v1312_v33  ;;  %v1314_v39 = vmax.f32 %v1280_v34, 0.0 }
 0x57a   : > { %v1313_v37 = vmax.f32 %v1275_v36, 0.0  ;;  %v2375_v38 = vpop.f32.mrb[44].mxu1 }
 0x57b   : > { %v1290_v40 = vadd.f32 %v2375_v38, %v1780_v2  ;;  %v1284_v41 = vpop.f32.mrb[45].mxu1 }
 0x57c   : > { %v1285_v42 = vadd.f32 %v1780_v2, %v1284_v41  ;;  %2426 = vmatprep.mubr.f32.mxu0 %v1313_v37 }
 0x57d   : > { %2427 = vmatmul.mubr.f32.gmra.mrb[58].mxu0 %v1314_v39  ;;  %v1316_v45 = vmax.f32 %v1290_v40, 0.0  ;;  %v1784_v39 = vld [vmem:[%s2959_s2 + $0x7] ss:$0 sm:$0xff] }
 0x57e   : > { %v1315_v43 = vmax.f32 %v1285_v42, 0.0  ;;  %v2378_v44 = vpop.f32.mrb[46].mxu1 }
 0x57f   : > { %v1300_v46 = vadd.f32 %v2378_v44, %v1780_v2  ;;  %v1294_v47 = vpop.f32.mrb[47].mxu1 }
 0x580   : > { %v1295_v48 = vadd.f32 %v1780_v2, %v1294_v47  ;;  %2429 = vmatprep.mubr.f32.mxu0 %v1315_v43 }
 0x581   : > { %2430 = vmatmul.mubr.f32.gmra.mrb[60].mxu0 %v1316_v45  ;;  %v1318_v50 = vmax.f32 %v1300_v46, 0.0 }
 0x582   : > { %v1317_v49 = vmax.f32 %v1295_v48, 0.0 }
 0x584   : > { %2432 = vmatprep.mubr.f32.mxu0 %v1317_v49 }
 0x585   : > { %2433 = vmatmul.mubr.f32.gmra.mrb[62].mxu0 %v1318_v50 }
 0x63c   : > { %v2413_v55 = vpop.f32.mrb[48].mxu0 }
 0x63d   : > { %v1416_v56 = vadd.f32 %v2413_v55, %v1782_v54  ;;  %v1410_v57 = vpop.f32.mrb[49].mxu0 }
 0x63e   : > { %v1411_v58 = vadd.f32 %v1782_v54, %v1410_v57 }
 0x63f   : > { %v1490_v61 = vmax.f32 %v1416_v56, 0.0 }
 0x640   : > { %v1489_v59 = vmax.f32 %v1411_v58, 0.0  ;;  %v2416_v60 = vpop.f32.mrb[50].mxu0 }
 0x641   : > { %v1426_v62 = vadd.f32 %v2416_v60, %v1782_v54  ;;  %v1420_v63 = vpop.f32.mrb[51].mxu0 }
 0x642   : > { %v1421_v0 = vadd.f32 %v1782_v54, %v1420_v63  ;;  %2467 = vmatprep.mubr.f32.mxu1 %v1489_v59 }
 0x643   : > { %2468 = vmatmul.mubr.f32.vlgmr.msra.gmra.mrb[48].mxu1 %v1490_v61  ;;  %v1492_v3 = vmax.f32 %v1426_v62, 0.0 }
 0x644   : > { %v1491_v1 = vmax.f32 %v1421_v0, 0.0  ;;  %v2419_v2 = vpop.f32.mrb[52].mxu0 }
 0x645   : > { %v1436_v4 = vadd.f32 %v2419_v2, %v1782_v54  ;;  %v1430_v5 = vpop.f32.mrb[53].mxu0 }
 0x646   : > { %v1431_v6 = vadd.f32 %v1782_v54, %v1430_v5  ;;  %2470 = vmatprep.mubr.f32.mxu1 %v1491_v1 }
 0x647   : > { %2471 = vmatmul.mubr.f32.gmra.mrb[50].mxu1 %v1492_v3  ;;  %v1494_v9 = vmax.f32 %v1436_v4, 0.0 }
 0x648   : > { %v1493_v7 = vmax.f32 %v1431_v6, 0.0  ;;  %v2422_v8 = vpop.f32.mrb[54].mxu0 }
 0x649   : > { %v1446_v10 = vadd.f32 %v2422_v8, %v1782_v54  ;;  %v1440_v11 = vpop.f32.mrb[55].mxu0 }
 0x64a   : > { %v1441_v12 = vadd.f32 %v1782_v54, %v1440_v11  ;;  %2473 = vmatprep.mubr.f32.mxu1 %v1493_v7 }
 0x64b   : > { %2474 = vmatmul.mubr.f32.gmra.mrb[52].mxu1 %v1494_v9  ;;  %v1496_v15 = vmax.f32 %v1446_v10, 0.0 }
 0x64c   : > { %v1495_v13 = vmax.f32 %v1441_v12, 0.0  ;;  %v2425_v14 = vpop.f32.mrb[56].mxu0 }
 0x64d   : > { %v1456_v16 = vadd.f32 %v2425_v14, %v1782_v54  ;;  %v1450_v17 = vpop.f32.mrb[57].mxu0 }
 0x64e   : > { %v1451_v18 = vadd.f32 %v1782_v54, %v1450_v17  ;;  %2476 = vmatprep.mubr.f32.mxu1 %v1495_v13 }
 0x64f   : > { %2477 = vmatmul.mubr.f32.gmra.mrb[54].mxu1 %v1496_v15  ;;  %v1498_v21 = vmax.f32 %v1456_v16, 0.0 }
 0x650   : > { %v1497_v19 = vmax.f32 %v1451_v18, 0.0  ;;  %v2428_v20 = vpop.f32.mrb[58].mxu0 }
 0x651   : > { %v1466_v22 = vadd.f32 %v2428_v20, %v1782_v54  ;;  %v1460_v23 = vpop.f32.mrb[59].mxu0 }
 0x652   : > { %v1461_v24 = vadd.f32 %v1782_v54, %v1460_v23  ;;  %2479 = vmatprep.mubr.f32.mxu1 %v1497_v19 }
 0x653   : > { %2480 = vmatmul.mubr.f32.gmra.mrb[56].mxu1 %v1498_v21  ;;  %v1500_v27 = vmax.f32 %v1466_v22, 0.0 }
 0x654   : > { %v1499_v25 = vmax.f32 %v1461_v24, 0.0  ;;  %v2431_v26 = vpop.f32.mrb[60].mxu0 }
 0x655   : > { %v1476_v28 = vadd.f32 %v2431_v26, %v1782_v54  ;;  %v1470_v29 = vpop.f32.mrb[61].mxu0 }
 0x656   : > { %v1471_v30 = vadd.f32 %v1782_v54, %v1470_v29  ;;  %2482 = vmatprep.mubr.f32.mxu1 %v1499_v25 }
 0x657   : > { %2483 = vmatmul.mubr.f32.gmra.mrb[58].mxu1 %v1500_v27  ;;  %v1502_v33 = vmax.f32 %v1476_v28, 0.0 }
 0x658   : > { %v1501_v31 = vmax.f32 %v1471_v30, 0.0  ;;  %v2434_v32 = vpop.f32.mrb[62].mxu0 }
 0x659   : > { %v1486_v34 = vadd.f32 %v2434_v32, %v1782_v54  ;;  %v1480_v35 = vpop.f32.mrb[63].mxu0 }
 0x65a   : > { %v1481_v36 = vadd.f32 %v1782_v54, %v1480_v35  ;;  %2485 = vmatprep.mubr.f32.mxu1 %v1501_v31 }
 0x65b   : > { %2486 = vmatmul.mubr.f32.gmra.mrb[60].mxu1 %v1502_v33  ;;  %v1504_v38 = vmax.f32 %v1486_v34, 0.0 }
 0x65c   : > { %v1503_v37 = vmax.f32 %v1481_v36, 0.0 }
 0x65e   : > { %2488 = vmatprep.mubr.f32.mxu1 %v1503_v37 }
 0x65f   : > { %2489 = vmatmul.mubr.f32.gmra.mrb[62].mxu1 %v1504_v38 }
 0x716   : > { %v2469_v40 = vpop.f32.mrb[48].mxu1 }
 0x717   : > { %v1602_v41 = vadd.f32 %v2469_v40, %v1784_v39  ;;  %v1596_v42 = vpop.f32.mrb[49].mxu1 }
 0x718   : > { %v1597_v43 = vadd.f32 %v1784_v39, %v1596_v42 }
 0x719   : > { %1676 = vst [vmem:[%s2936_s28 + $0x8] sm:$0xff] %v1602_v41 }
 0x71a   : > { %1675 = vst [vmem:[%s2936_s28] sm:$0xff] %v1597_v43  ;;  %v2472_v44 = vpop.f32.mrb[50].mxu1 }
 0x71b   : > { %v1612_v45 = vadd.f32 %v2472_v44, %v1784_v39  ;;  %v1606_v46 = vpop.f32.mrb[51].mxu1 }
 0x71c   : > { %v1607_v47 = vadd.f32 %v1784_v39, %v1606_v46 }
 0x71d   : > { %1678 = vst [vmem:[%s2936_s28 + $0x18] sm:$0xff] %v1612_v45 }
 0x71e   : > { %1677 = vst [vmem:[%s2936_s28 + $0x10] sm:$0xff] %v1607_v47  ;;  %v2475_v48 = vpop.f32.mrb[52].mxu1 }
 0x71f   : > { %v1622_v49 = vadd.f32 %v2475_v48, %v1784_v39  ;;  %v1616_v50 = vpop.f32.mrb[53].mxu1 }
 0x720   : > { %v1617_v51 = vadd.f32 %v1784_v39, %v1616_v50 }
 0x721   : > { %1680 = vst [vmem:[%s2936_s28 + $0x28] sm:$0xff] %v1622_v49 }
 0x722   : > { %1679 = vst [vmem:[%s2936_s28 + $0x20] sm:$0xff] %v1617_v51  ;;  %v2478_v52 = vpop.f32.mrb[54].mxu1 }
 0x723   : > { %v1632_v53 = vadd.f32 %v2478_v52, %v1784_v39  ;;  %v1626_v54 = vpop.f32.mrb[55].mxu1 }
 0x724   : > { %v1627_v55 = vadd.f32 %v1784_v39, %v1626_v54 }
 0x725   : > { %1682 = vst [vmem:[%s2936_s28 + $0x38] sm:$0xff] %v1632_v53 }
 0x726   : > { %1681 = vst [vmem:[%s2936_s28 + $0x30] sm:$0xff] %v1627_v55  ;;  %v2481_v56 = vpop.f32.mrb[56].mxu1 }
 0x727   : > { %v1642_v57 = vadd.f32 %v2481_v56, %v1784_v39  ;;  %v1636_v58 = vpop.f32.mrb[57].mxu1 }
 0x728   : > { %v1637_v59 = vadd.f32 %v1784_v39, %v1636_v58 }
 0x729   : > { %1684 = vst [vmem:[%s2936_s28 + $0x48] sm:$0xff] %v1642_v57 }
 0x72a   : > { %1683 = vst [vmem:[%s2936_s28 + $0x40] sm:$0xff] %v1637_v59  ;;  %v2484_v60 = vpop.f32.mrb[58].mxu1 }
 0x72b   : > { %v1652_v61 = vadd.f32 %v2484_v60, %v1784_v39  ;;  %v1646_v62 = vpop.f32.mrb[59].mxu1 }
 0x72c   : > { %v1647_v63 = vadd.f32 %v1784_v39, %v1646_v62 }
 0x72d   : > { %1686 = vst [vmem:[%s2936_s28 + $0x58] sm:$0xff] %v1652_v61 }
 0x72e   : > { %1685 = vst [vmem:[%s2936_s28 + $0x50] sm:$0xff] %v1647_v63  ;;  %v2487_v0 = vpop.f32.mrb[60].mxu1 }
 0x72f   : > { %v1662_v1 = vadd.f32 %v2487_v0, %v1784_v39  ;;  %v1656_v2 = vpop.f32.mrb[61].mxu1 }
 0x730   : > { %v1657_v3 = vadd.f32 %v1784_v39, %v1656_v2 }
 0x731   : > { %1688 = vst [vmem:[%s2936_s28 + $0x68] sm:$0xff] %v1662_v1 }
 0x732   : > { %1687 = vst [vmem:[%s2936_s28 + $0x60] sm:$0xff] %v1657_v3  ;;  %v2490_v4 = vpop.f32.mrb[62].mxu1 }
 0x733   : > { %v1672_v5 = vadd.f32 %v2490_v4, %v1784_v39  ;;  %v1666_v6 = vpop.f32.mrb[63].mxu1 }
 0x734   : > { %v1667_v7 = vadd.f32 %v1784_v39, %v1666_v6 }
 0x735   : > { %1690 = vst [vmem:[%s2936_s28 + $0x78] sm:$0xff] %v1672_v5 }
 0x736   : > { %1689 = vst [vmem:[%s2936_s28 + $0x70] sm:$0xff] %v1667_v7 }
 0x737 PF: > { %s14_s12 = sadd.s32 1, %s2806_s12  }
 0x738   : > { %p11_p3 = scmp.ge.s32.totalorder %s14_s12, 4  }
 0x73a   :  { %13 = sbr.rel (!%p11_p3) target bundleno = 1 (0x1), region = 81 }
 0x741   :  { %1713 = vsyncpa [#allocation3], 1 }
 0x742   :  { %1715 = vsyncpa [#allocation3 + $0x1], 1 }

</bundles_post_ra>
